<compile_context>
chip_gen: v7x
topology: tpu7x:2x2x1
jax: 0.10.0
libtpu: 0.0.40
codegen_flags: <defaults>
</compile_context>

<pallas_src>
import functools

import jax
import jax.numpy as jnp
from jax.experimental import pallas as pl
from jax.experimental.pallas import tpu as pltpu


LANES = 128          # lane-dense slab width for GCN / classifier outputs
K_SORT = 30          # SortAggregation k
GCN_FEAT = 97        # 32 + 32 + 32 + 1 concatenated GCN channels
CONV6_TAPS = 5
POOL_T = K_SORT // 2          # 15 time steps after MaxPool1d(2,2)
CONV6_T = POOL_T - CONV6_TAPS + 1   # 11 conv6 output time steps


# ----------------------------------------------------------------------------
# Helpers
# ----------------------------------------------------------------------------
def _vmem_specs(n):
    return [pl.BlockSpec(memory_space=pltpu.MemorySpace.VMEM) for _ in range(n)]


def _out_vmem():
    return pl.BlockSpec(memory_space=pltpu.MemorySpace.VMEM)


# ----------------------------------------------------------------------------
# Kernel 1: fused 4-layer GCN stack + channel concat  -> [N, 128] f32 slab
# ----------------------------------------------------------------------------
def gcn_stack_kernel(adj_ref, x_ref, w1_ref, b1_ref, w2_ref, b2_ref,
                     w3_ref, b3_ref, w4_ref, b4_ref, out_ref):
    adj = adj_ref[...]                                     # [N, N] bf16, loaded once

    def gcn(h_bf16, w_ref, b_ref):
        # bf16 MXU operands, f32 accumulation (review: bf16-native MXU).
        xw = jnp.dot(h_bf16, w_ref[...], preferred_element_type=jnp.float32)
        agg = jnp.dot(adj, xw.astype(jnp.bfloat16),
                      preferred_element_type=jnp.float32)
        return jnp.tanh(agg + b_ref[...])                  # f32 [N, 32]

    h1 = gcn(x_ref[...], w1_ref, b1_ref)
    h2 = gcn(h1.astype(jnp.bfloat16), w2_ref, b2_ref)
    h3 = gcn(h2.astype(jnp.bfloat16), w3_ref, b3_ref)
    h4 = gcn(h3.astype(jnp.bfloat16), w4_ref, b4_ref)      # col 0 real, rest exactly 0
    out_ref[...] = jnp.concatenate([h1, h2, h3, h4], axis=-1)   # [N, 128] lane-dense


def gcn_stack(adj_bf16, x_bf16, kp):
    n, f = x_bf16.shape
    # Explicit scoped-VMEM budget (review): resident bf16 adj + output slab.
    vmem_needed = 2 * n * n + 4 * n * LANES + 2 * n * f + (1 << 16)
    vmem_limit = int(min(64 * 2**20, max(32 * 2**20, 4 * vmem_needed)))
    flops = int(2 * n * 32 * (f + 32 + 32 + 32) + 4 * 2 * n * n * 32)
    # TODO(synk): for very large N (v7x 64 MiB VMEM) stream adj in column
    # blocks over an 'arbitrary' grid axis instead of holding it resident.
    return pl.pallas_call(
        gcn_stack_kernel,
        out_shape=jax.ShapeDtypeStruct((n, LANES), jnp.float32),
        in_specs=_vmem_specs(10),
        out_specs=_out_vmem(),
        compiler_params=pltpu.CompilerParams(vmem_limit_bytes=vmem_limit),
        cost_estimate=pl.CostEstimate(
            flops=flops,
            transcendentals=int(4 * n * 32),
            bytes_accessed=int(2 * n * n + 2 * n * f + 4 * n * LANES + 4 * 4096)),
    )(adj_bf16, x_bf16, kp["w1"], kp["b1"], kp["w2"], kp["b2"],
      kp["w3"], kp["b3"], kp["w4p"], kp["b4p"])


# ----------------------------------------------------------------------------
# Kernel 2: fused sort-pool gather + conv5 -> pool -> conv6 -> fc1 -> fc2 -> lsm
# ----------------------------------------------------------------------------
def classifier_kernel(idx_ref, h_ref, w5_ref, b5_ref, w6_ref, b6_ref,
                      fc1w_ref, fc1b_ref, fc2w_ref, fc2b_ref, out_ref,
                      *, num_graphs, num_classes):
    n_nodes = h_ref.shape[0]
    b = num_graphs
    rows = 2 * POOL_T * b                   # B*30 gathered node rows

    # --- fused SortAggregation gather: exact one-hot matmul on the MXU.
    #     Row ordering (prepared host-side): first all EVEN time steps, then all
    #     ODD, each half time-major (row = t*B + graph).  Invalid idx (-1)
    #     produces an all-zero row (= SortAggregation zero padding).
    idx = idx_ref[...]                                                # [rows, 1] int32
    iota = jax.lax.broadcasted_iota(jnp.int32, (rows, n_nodes), 1)
    onehot = (idx == iota).astype(jnp.float32)                        # [rows, N]
    pooled = jnp.dot(onehot, h_ref[...],
                     preferred_element_type=jnp.float32)              # [rows, 128]

    # --- conv5 (Conv1d(1,16,97,97)) + ReLU: one batched matmul for all graphs
    y5 = jnp.maximum(
        jnp.dot(pooled, w5_ref[...], preferred_element_type=jnp.float32)
        + b5_ref[...], 0.0)                                           # [rows, 16]

    # --- MaxPool1d(2,2): even-time rows are the first half, odd-time the second
    y5p = jnp.maximum(y5[:POOL_T * b, :], y5[POOL_T * b:, :])         # [15*B, 16]

    # --- conv6 (Conv1d(16,32,5,1)) as a single K=80 im2col matmul + ReLU
    im2col = jnp.concatenate(
        [y5p[tap * b: tap * b + CONV6_T * b, :] for tap in range(CONV6_TAPS)],
        axis=1)                                                       # [11*B, 80]
    y6 = jnp.maximum(
        jnp.dot(im2col, w6_ref[...], preferred_element_type=jnp.float32)
        + b6_ref[...], 0.0)                                           # [11*B, 32]

    # --- classifier_1 + ReLU: flatten conv6 output to [B, 352] (lane = t*32+o,
    #     fc1 weight is host-permuted to match torch's o*11+t flatten order)
    y6_wide = jnp.concatenate(
        [y6[t * b:(t + 1) * b, :] for t in range(CONV6_T)], axis=1)   # [B, 352]
    f1 = jnp.maximum(
        jnp.dot(y6_wide, fc1w_ref[...], preferred_element_type=jnp.float32)
        + fc1b_ref[...], 0.0)                                         # [B, 128]
    # TODO(synk): Dropout(0.5) is an eval-mode identity (no RNG mask).

    # --- classifier_2 + masked log_softmax over a 128-lane class slab
    logits = jnp.dot(f1, fc2w_ref[...],
                     preferred_element_type=jnp.float32) + fc2b_ref[...]   # [B, 128]
    col = jax.lax.broadcasted_iota(jnp.int32, logits.shape, 1)
    valid = col < num_classes
    logits = jnp.where(valid, logits, -1e30)
    m = jnp.max(logits, axis=-1, keepdims=True)
    s = logits - m
    lse = jnp.log(jnp.sum(jnp.where(valid, jnp.exp(s), 0.0),
                          axis=-1, keepdims=True))
    out_ref[...] = s - lse


def classifier_head(idx_col, h, kp, num_graphs, num_classes):
    n = h.shape[0]
    rows = 2 * POOL_T * num_graphs
    kernel = functools.partial(classifier_kernel,
                               num_graphs=num_graphs, num_classes=num_classes)
    flops = int(2 * rows * n * LANES + 2 * rows * LANES * 16
                + 2 * CONV6_T * num_graphs * 80 * 32
                + 2 * num_graphs * 352 * LANES + 2 * num_graphs * LANES * LANES)
    bytes_accessed = int(4 * n * LANES + 4 * rows
                         + 4 * (LANES * 16 + 80 * 32 + 352 * LANES + LANES * LANES)
                         + 4 * num_graphs * LANES)
    return pl.pallas_call(
        kernel,
        out_shape=jax.ShapeDtypeStruct((num_graphs, LANES), jnp.float32),
        in_specs=_vmem_specs(10),
        out_specs=_out_vmem(),
        cost_estimate=pl.CostEstimate(flops=flops,
                                      transcendentals=int(num_graphs * LANES),
                                      bytes_accessed=bytes_accessed),
    )(idx_col, h, kp["w5p"], kp["b5"], kp["w6p"], kp["b6"],
      kp["fc1_wp"], kp["fc1_b"], kp["fc2_wp"], kp["fc2_bp"])


# ----------------------------------------------------------------------------
# Glue (graph preprocessing, sort ordering) in plain JAX
# ----------------------------------------------------------------------------
def build_gcn_adj(edge_index, num_nodes):
    """remove_self_loops + GCNConv's add_self_loops + symmetric norm (dense).
    Duplicate edges accumulate (matches PyG message passing)."""
    src, dst = edge_index[0], edge_index[1]
    adj = jnp.zeros((num_nodes, num_nodes), jnp.float32).at[dst, src].add(1.0)
    eye = jnp.eye(num_nodes, dtype=jnp.float32)
    adj = adj * (1.0 - eye) + eye
    deg = adj.sum(axis=1)
    d_inv_sqrt = jnp.where(deg > 0, jax.lax.rsqrt(deg), 0.0)
    return d_inv_sqrt[:, None] * adj * d_inv_sqrt[None, :]


def sort_pool_indices(last, batch, num_graphs, k):
    """SortAggregation(k) index computation: per-graph descending sort by the
    last GCN channel, keep k slots, -1 for padding.  Returned as a [B*k, 1]
    int32 column whose row order (even times first, then odd, each time-major)
    is exactly what classifier_kernel's fused gather expects.
    TODO(synk): argsort has no clean Pallas TPU equivalent; done in plain JAX."""
    n = last.shape[0]
    # |last| < 1 because conv4 is tanh-activated, so this composite key gives a
    # graph-major, within-graph-descending order.
    key = batch.astype(jnp.float32) * 4.0 - last
    order = jnp.argsort(key)
    counts = jnp.zeros((num_graphs,), jnp.int32).at[batch].add(1)
    offsets = jnp.concatenate(
        [jnp.zeros((1,), jnp.int32), jnp.cumsum(counts)[:-1]])
    pos = offsets[:, None] + jnp.arange(k, dtype=jnp.int32)[None, :]
    valid = jnp.arange(k, dtype=jnp.int32)[None, :] < counts[:, None]
    node_idx = jnp.where(valid,
                         order[jnp.clip(pos, 0, n - 1)].astype(jnp.int32),
                         jnp.int32(-1))                               # [B, k]
    even_tm = node_idx[:, 0::2].T.reshape(-1)                         # [15*B], row = t*B + b
    odd_tm = node_idx[:, 1::2].T.reshape(-1)
    return jnp.concatenate([even_tm, odd_tm])[:, None]                # [B*k, 1]


@functools.partial(jax.jit, static_argnames=("num_graphs", "num_classes"))
def forward(kp, x, edge_index, batch, num_graphs, num_classes):
    n = x.shape[0]
    adj = build_gcn_adj(edge_index, n).astype(jnp.bfloat16)

    h = gcn_stack(adj, x.astype(jnp.bfloat16), kp)           # [N, 128] f32 (97 real ch)
    idx_col = sort_pool_indices(h[:, GCN_FEAT - 1], batch, num_graphs, K_SORT)
    logp = classifier_head(idx_col, h, kp, num_graphs, num_classes)   # [B, 128]
    return logp[:, :num_classes]


# ----------------------------------------------------------------------------
# Parameters (deterministic init + one-time kernel-friendly re-layout)
# ----------------------------------------------------------------------------
def glorot(key, shape):
    lim = jnp.sqrt(6.0 / (shape[0] + shape[1]))
    return jax.random.uniform(key, shape, jnp.float32, -lim, lim)


def uniform_fan(key, shape, fan_in):
    lim = 1.0 / jnp.sqrt(fan_in)
    return jax.random.uniform(key, shape, jnp.float32, -lim, lim)


def init_params(key, num_features, num_classes):
    ks = jax.random.split(key, 12)
    p = {}
    p["w1"], p["b1"] = glorot(ks[0], (num_features, 32)), jnp.zeros((32,), jnp.float32)
    p["w2"], p["b2"] = glorot(ks[1], (32, 32)), jnp.zeros((32,), jnp.float32)
    p["w3"], p["b3"] = glorot(ks[2], (32, 32)), jnp.zeros((32,), jnp.float32)
    p["w4"], p["b4"] = glorot(ks[3], (32, 1)), jnp.zeros((1,), jnp.float32)
    p["conv5_w"] = uniform_fan(ks[4], (16, 1, 97), 1 * 97)      # Conv1d(1, 16, 97, 97)
    p["conv5_b"] = uniform_fan(ks[5], (16,), 1 * 97)
    p["conv6_w"] = uniform_fan(ks[6], (32, 16, 5), 16 * 5)      # Conv1d(16, 32, 5, 1)
    p["conv6_b"] = uniform_fan(ks[7], (32,), 16 * 5)
    p["fc1_w"] = uniform_fan(ks[8], (352, 128), 352)            # Linear(352, 128)
    p["fc1_b"] = uniform_fan(ks[9], (128,), 352)
    p["fc2_w"] = uniform_fan(ks[10], (128, num_classes), 128)   # Linear(128, C)
    p["fc2_b"] = uniform_fan(ks[11], (num_classes,), 128)
    return p


def prepare_params(p, num_classes):
    """One-time host-side re-layout so the fused kernels need no in-kernel
    transposes/reshapes and every contraction / store is lane-friendly."""
    bf = jnp.bfloat16
    kp = {
        "w1": p["w1"].astype(bf), "b1": p["b1"][None, :],
        "w2": p["w2"].astype(bf), "b2": p["b2"][None, :],
        "w3": p["w3"].astype(bf), "b3": p["b3"][None, :],
    }
    # conv4 (32 -> 1) padded to 32 output lanes; padded lanes stay exactly 0
    kp["w4p"] = jnp.zeros((32, 32), jnp.float32).at[:, 0].set(p["w4"][:, 0]).astype(bf)
    kp["b4p"] = jnp.zeros((1, 32), jnp.float32).at[0, 0].set(p["b4"][0])
    # conv5 as a [97,16] matmul, zero-padded to 128 contraction rows
    kp["w5p"] = jnp.zeros((LANES, 16), jnp.float32).at[:GCN_FEAT, :].set(
        p["conv5_w"].reshape(16, GCN_FEAT).T)
    kp["b5"] = p["conv5_b"][None, :]
    # conv6 packed for a single K=80 im2col matmul: row index = tap*16 + in_ch
    kp["w6p"] = jnp.transpose(p["conv6_w"], (2, 1, 0)).reshape(CONV6_TAPS * 16, 32)
    kp["b6"] = p["conv6_b"][None, :]
    # classifier_1: kernel flattens conv6 output with lane = t*32 + o, while
    # torch's .view(B,-1) flatten is o*11 + t; permute the weight rows to match.
    kp["fc1_wp"] = p["fc1_w"].reshape(32, CONV6_T, LANES).transpose(1, 0, 2) \
                             .reshape(CONV6_T * 32, LANES)
    kp["fc1_b"] = p["fc1_b"][None, :]
    # classifier_2 padded to 128 output lanes; padding handled by an explicit
    # lane mask inside the kernel (no -inf-ish biases needed).
    kp["fc2_wp"] = jnp.zeros((LANES, LANES), jnp.float32).at[:, :num_classes].set(p["fc2_w"])
    kp["fc2_bp"] = jnp.zeros((1, LANES), jnp.float32).at[0, :num_classes].set(p["fc2_b"])
    return kp


# ----------------------------------------------------------------------------
# Main
# ----------------------------------------------------------------------------
if __name__ == "__main__":
    num_features = 8
    num_classes = 4
    nodes_per_graph = 20
    num_graphs = 2
    n_nodes = nodes_per_graph * num_graphs  # 40

    root = jax.random.PRNGKey(0)
    k_param, k_x, k_e0, k_e1 = jax.random.split(root, 4)

    params = init_params(k_param, num_features, num_classes)
    kp = prepare_params(params, num_classes)

    # node features
    x = jax.random.normal(k_x, (n_nodes, num_features), jnp.float32)

    # random intra-graph edges (made symmetric); self loops handled in build_gcn_adj
    e0 = jax.random.randint(k_e0, (2, 60), 0, nodes_per_graph)
    e1 = jax.random.randint(k_e1, (2, 60), nodes_per_graph, n_nodes)
    edge_index = jnp.concatenate([e0, e1], axis=1)
    edge_index = jnp.concatenate([edge_index, edge_index[::-1]], axis=1)  # [2, 240]

    batch = jnp.concatenate(
        [jnp.full((nodes_per_graph,), g, jnp.int32) for g in range(num_graphs)])

    out = forward(kp, x, edge_index, batch, num_graphs, num_classes)
    out = jax.block_until_ready(out)

    assert out.shape == (num_graphs, num_classes), out.shape
    assert bool(jnp.all(jnp.isfinite(out)))
    # log_softmax rows should sum (in prob space) to ~1
    assert bool(jnp.allclose(jnp.sum(jnp.exp(out), axis=-1), 1.0, atol=1e-4))
    print("KERNEL_OK")
</pallas_src>

<mosaic_0001>
module attributes {stable_mosaic.version = 11 : i64} {
  func.func private @main(%arg0: i32) attributes {dimension_semantics = [#tpu.dimension_semantics<core_parallel>], iteration_bounds = array<i64: 2>, tpu.core_type = #tpu.core_type<sc_scalar_subcore>, window_params = []} {
    return
  }
}

module attributes {stable_mosaic.version = 11 : i64} {
  func.func private @main(%arg0: i32) attributes {dimension_semantics = [#tpu.dimension_semantics<core_parallel>], iteration_bounds = array<i64: 2>, tpu.core_type = #tpu.core_type<sc_scalar_subcore>, window_params = []} {
    return
  }
}

module attributes {stable_mosaic.version = 11 : i64} {
  func.func @gcn_stack_kernel(%arg0: memref<40x40xbf16, #tpu.memory_space<vmem>>, %arg1: memref<40x8xbf16, #tpu.memory_space<vmem>>, %arg2: memref<8x32xbf16, #tpu.memory_space<vmem>>, %arg3: memref<1x32xf32, #tpu.memory_space<vmem>>, %arg4: memref<32x32xbf16, #tpu.memory_space<vmem>>, %arg5: memref<1x32xf32, #tpu.memory_space<vmem>>, %arg6: memref<32x32xbf16, #tpu.memory_space<vmem>>, %arg7: memref<1x32xf32, #tpu.memory_space<vmem>>, %arg8: memref<32x32xbf16, #tpu.memory_space<vmem>>, %arg9: memref<1x32xf32, #tpu.memory_space<vmem>>, %arg10: memref<40x128xf32, #tpu.memory_space<vmem>>) attributes {dimension_semantics = [], scalar_prefetch = 0 : i64, scratch_operands = 0 : i64, tpu.core_type = #tpu.core_type<tc>} {
    %c0 = arith.constant 0 : index
    %c0_0 = arith.constant 0 : index
    %0 = vector.load %arg0[%c0, %c0_0] : memref<40x40xbf16, #tpu.memory_space<vmem>>, vector<40x40xbf16>
    %c0_1 = arith.constant 0 : index
    %c0_2 = arith.constant 0 : index
    %1 = vector.load %arg1[%c0_1, %c0_2] : memref<40x8xbf16, #tpu.memory_space<vmem>>, vector<40x8xbf16>
    %c0_3 = arith.constant 0 : index
    %c0_4 = arith.constant 0 : index
    %2 = vector.load %arg2[%c0_3, %c0_4] : memref<8x32xbf16, #tpu.memory_space<vmem>>, vector<8x32xbf16>
    %cst = arith.constant dense<0.000000e+00> : vector<40x32xf32>
    %3 = tpu.matmul %1, %2, %cst {dimension_numbers = #tpu.dot_dimension_numbers<[1], [0], [0], [1], [0, 0, 1, 1], [], []>} : vector<40x8xbf16>, vector<8x32xbf16>, vector<40x32xf32> -> vector<40x32xf32>
    %4 = arith.truncf %3 : vector<40x32xf32> to vector<40x32xbf16>
    %cst_5 = arith.constant dense<0.000000e+00> : vector<40x32xf32>
    %5 = tpu.matmul %0, %4, %cst_5 {dimension_numbers = #tpu.dot_dimension_numbers<[1], [0], [0], [1], [0, 0, 1, 1], [], []>} : vector<40x40xbf16>, vector<40x32xbf16>, vector<40x32xf32> -> vector<40x32xf32>
    %c0_6 = arith.constant 0 : index
    %c0_7 = arith.constant 0 : index
    %6 = vector.load %arg3[%c0_6, %c0_7] : memref<1x32xf32, #tpu.memory_space<vmem>>, vector<1x32xf32>
    %7 = vector.broadcast %6 : vector<1x32xf32> to vector<40x32xf32>
    %8 = arith.addf %5, %7 : vector<40x32xf32>
    %9 = math.tanh %8 : vector<40x32xf32>
    %10 = arith.truncf %9 : vector<40x32xf32> to vector<40x32xbf16>
    %c0_8 = arith.constant 0 : index
    %c0_9 = arith.constant 0 : index
    %11 = vector.load %arg4[%c0_8, %c0_9] : memref<32x32xbf16, #tpu.memory_space<vmem>>, vector<32x32xbf16>
    %cst_10 = arith.constant dense<0.000000e+00> : vector<40x32xf32>
    %12 = tpu.matmul %10, %11, %cst_10 {dimension_numbers = #tpu.dot_dimension_numbers<[1], [0], [0], [1], [0, 0, 1, 1], [], []>} : vector<40x32xbf16>, vector<32x32xbf16>, vector<40x32xf32> -> vector<40x32xf32>
    %13 = arith.truncf %12 : vector<40x32xf32> to vector<40x32xbf16>
    %cst_11 = arith.constant dense<0.000000e+00> : vector<40x32xf32>
    %14 = tpu.matmul %0, %13, %cst_11 {dimension_numbers = #tpu.dot_dimension_numbers<[1], [0], [0], [1], [0, 0, 1, 1], [], []>} : vector<40x40xbf16>, vector<40x32xbf16>, vector<40x32xf32> -> vector<40x32xf32>
    %c0_12 = arith.constant 0 : index
    %c0_13 = arith.constant 0 : index
    %15 = vector.load %arg5[%c0_12, %c0_13] : memref<1x32xf32, #tpu.memory_space<vmem>>, vector<1x32xf32>
    %16 = vector.broadcast %15 : vector<1x32xf32> to vector<40x32xf32>
    %17 = arith.addf %14, %16 : vector<40x32xf32>
    %18 = math.tanh %17 : vector<40x32xf32>
    %19 = arith.truncf %18 : vector<40x32xf32> to vector<40x32xbf16>
    %c0_14 = arith.constant 0 : index
    %c0_15 = arith.constant 0 : index
    %20 = vector.load %arg6[%c0_14, %c0_15] : memref<32x32xbf16, #tpu.memory_space<vmem>>, vector<32x32xbf16>
    %cst_16 = arith.constant dense<0.000000e+00> : vector<40x32xf32>
    %21 = tpu.matmul %19, %20, %cst_16 {dimension_numbers = #tpu.dot_dimension_numbers<[1], [0], [0], [1], [0, 0, 1, 1], [], []>} : vector<40x32xbf16>, vector<32x32xbf16>, vector<40x32xf32> -> vector<40x32xf32>
    %22 = arith.truncf %21 : vector<40x32xf32> to vector<40x32xbf16>
    %cst_17 = arith.constant dense<0.000000e+00> : vector<40x32xf32>
    %23 = tpu.matmul %0, %22, %cst_17 {dimension_numbers = #tpu.dot_dimension_numbers<[1], [0], [0], [1], [0, 0, 1, 1], [], []>} : vector<40x40xbf16>, vector<40x32xbf16>, vector<40x32xf32> -> vector<40x32xf32>
    %c0_18 = arith.constant 0 : index
    %c0_19 = arith.constant 0 : index
    %24 = vector.load %arg7[%c0_18, %c0_19] : memref<1x32xf32, #tpu.memory_space<vmem>>, vector<1x32xf32>
    %25 = vector.broadcast %24 : vector<1x32xf32> to vector<40x32xf32>
    %26 = arith.addf %23, %25 : vector<40x32xf32>
    %27 = math.tanh %26 : vector<40x32xf32>
    %28 = arith.truncf %27 : vector<40x32xf32> to vector<40x32xbf16>
    %c0_20 = arith.constant 0 : index
    %c0_21 = arith.constant 0 : index
    %29 = vector.load %arg8[%c0_20, %c0_21] : memref<32x32xbf16, #tpu.memory_space<vmem>>, vector<32x32xbf16>
    %cst_22 = arith.constant dense<0.000000e+00> : vector<40x32xf32>
    %30 = tpu.matmul %28, %29, %cst_22 {dimension_numbers = #tpu.dot_dimension_numbers<[1], [0], [0], [1], [0, 0, 1, 1], [], []>} : vector<40x32xbf16>, vector<32x32xbf16>, vector<40x32xf32> -> vector<40x32xf32>
    %31 = arith.truncf %30 : vector<40x32xf32> to vector<40x32xbf16>
    %cst_23 = arith.constant dense<0.000000e+00> : vector<40x32xf32>
    %32 = tpu.matmul %0, %31, %cst_23 {dimension_numbers = #tpu.dot_dimension_numbers<[1], [0], [0], [1], [0, 0, 1, 1], [], []>} : vector<40x40xbf16>, vector<40x32xbf16>, vector<40x32xf32> -> vector<40x32xf32>
    %c0_24 = arith.constant 0 : index
    %c0_25 = arith.constant 0 : index
    %33 = vector.load %arg9[%c0_24, %c0_25] : memref<1x32xf32, #tpu.memory_space<vmem>>, vector<1x32xf32>
    %34 = vector.broadcast %33 : vector<1x32xf32> to vector<40x32xf32>
    %35 = arith.addf %32, %34 : vector<40x32xf32>
    %36 = math.tanh %35 : vector<40x32xf32>
    %37 = tpu.concatenate %9, %18, %27, %36 in 1 : vector<40x32xf32>, vector<40x32xf32>, vector<40x32xf32>, vector<40x32xf32> -> vector<40x128xf32>
    %c0_26 = arith.constant 0 : index
    %c0_27 = arith.constant 0 : index
    %38 = vector.load %arg10[%c0_26, %c0_27] : memref<40x128xf32, #tpu.memory_space<vmem>>, vector<40x128xf32>
    tpu.vector_store %arg10[%c0_26, %c0_27], %37 {strides = array<i32>} : memref<40x128xf32, #tpu.memory_space<vmem>>, vector<40x128xf32>,
    return
  }
}

module attributes {stable_mosaic.version = 11 : i64} {
  func.func @classifier_kernel(%arg0: memref<60x1xi32, #tpu.memory_space<vmem>>, %arg1: memref<40x128xf32, #tpu.memory_space<vmem>>, %arg2: memref<128x16xf32, #tpu.memory_space<vmem>>, %arg3: memref<1x16xf32, #tpu.memory_space<vmem>>, %arg4: memref<80x32xf32, #tpu.memory_space<vmem>>, %arg5: memref<1x32xf32, #tpu.memory_space<vmem>>, %arg6: memref<352x128xf32, #tpu.memory_space<vmem>>, %arg7: memref<1x128xf32, #tpu.memory_space<vmem>>, %arg8: memref<128x128xf32, #tpu.memory_space<vmem>>, %arg9: memref<1x128xf32, #tpu.memory_space<vmem>>, %arg10: memref<2x128xf32, #tpu.memory_space<vmem>>) attributes {dimension_semantics = [], scalar_prefetch = 0 : i64, scratch_operands = 0 : i64, tpu.core_type = #tpu.core_type<tc>} {
    %c0 = arith.constant 0 : index
    %c0_0 = arith.constant 0 : index
    %0 = vector.load %arg0[%c0, %c0_0] : memref<60x1xi32, #tpu.memory_space<vmem>>, vector<60x1xi32>
    %1 = tpu.iota {dimensions = array<i32: 1>} : vector<60x40xi32>
    %2 = vector.broadcast %0 : vector<60x1xi32> to vector<60x40xi32>
    %3 = arith.cmpi eq, %2, %1 : vector<60x40xi32>
    %4 = arith.extui %3 : vector<60x40xi1> to vector<60x40xi32>
    %5 = arith.sitofp %4 : vector<60x40xi32> to vector<60x40xf32>
    %c0_1 = arith.constant 0 : index
    %c0_2 = arith.constant 0 : index
    %6 = vector.load %arg1[%c0_1, %c0_2] : memref<40x128xf32, #tpu.memory_space<vmem>>, vector<40x128xf32>
    %cst = arith.constant dense<0.000000e+00> : vector<60x128xf32>
    %7 = tpu.matmul %5, %6, %cst {dimension_numbers = #tpu.dot_dimension_numbers<[1], [0], [0], [1], [0, 0, 1, 1], [], []>} : vector<60x40xf32>, vector<40x128xf32>, vector<60x128xf32> -> vector<60x128xf32>
    %c0_3 = arith.constant 0 : index
    %c0_4 = arith.constant 0 : index
    %8 = vector.load %arg2[%c0_3, %c0_4] : memref<128x16xf32, #tpu.memory_space<vmem>>, vector<128x16xf32>
    %cst_5 = arith.constant dense<0.000000e+00> : vector<60x16xf32>
    %9 = tpu.matmul %7, %8, %cst_5 {dimension_numbers = #tpu.dot_dimension_numbers<[1], [0], [0], [1], [0, 0, 1, 1], [], []>} : vector<60x128xf32>, vector<128x16xf32>, vector<60x16xf32> -> vector<60x16xf32>
    %c0_6 = arith.constant 0 : index
    %c0_7 = arith.constant 0 : index
    %10 = vector.load %arg3[%c0_6, %c0_7] : memref<1x16xf32, #tpu.memory_space<vmem>>, vector<1x16xf32>
    %11 = vector.broadcast %10 : vector<1x16xf32> to vector<60x16xf32>
    %12 = arith.addf %9, %11 : vector<60x16xf32>
    %cst_8 = arith.constant 0.000000e+00 : f32
    %13 = vector.broadcast %cst_8 : f32 to vector<60x16xf32>
    %14 = arith.maximumf %12, %13 : vector<60x16xf32>
    %15 = vector.extract_strided_slice %14 {offsets = [0, 0], sizes = [30, 16], strides = [1, 1]} : vector<60x16xf32> to vector<30x16xf32>
    %16 = vector.extract_strided_slice %14 {offsets = [30, 0], sizes = [30, 16], strides = [1, 1]} : vector<60x16xf32> to vector<30x16xf32>
    %17 = arith.maximumf %15, %16 : vector<30x16xf32>
    %18 = vector.extract_strided_slice %17 {offsets = [0, 0], sizes = [22, 16], strides = [1, 1]} : vector<30x16xf32> to vector<22x16xf32>
    %19 = vector.extract_strided_slice %17 {offsets = [2, 0], sizes = [22, 16], strides = [1, 1]} : vector<30x16xf32> to vector<22x16xf32>
    %20 = vector.extract_strided_slice %17 {offsets = [4, 0], sizes = [22, 16], strides = [1, 1]} : vector<30x16xf32> to vector<22x16xf32>
    %21 = vector.extract_strided_slice %17 {offsets = [6, 0], sizes = [22, 16], strides = [1, 1]} : vector<30x16xf32> to vector<22x16xf32>
    %22 = vector.extract_strided_slice %17 {offsets = [8, 0], sizes = [22, 16], strides = [1, 1]} : vector<30x16xf32> to vector<22x16xf32>
    %23 = tpu.concatenate %18, %19, %20, %21, %22 in 1 : vector<22x16xf32>, vector<22x16xf32>, vector<22x16xf32>, vector<22x16xf32>, vector<22x16xf32> -> vector<22x80xf32>
    %c0_9 = arith.constant 0 : index
    %c0_10 = arith.constant 0 : index
    %24 = vector.load %arg4[%c0_9, %c0_10] : memref<80x32xf32, #tpu.memory_space<vmem>>, vector<80x32xf32>
    %cst_11 = arith.constant dense<0.000000e+00> : vector<22x32xf32>
    %25 = tpu.matmul %23, %24, %cst_11 {dimension_numbers = #tpu.dot_dimension_numbers<[1], [0], [0], [1], [0, 0, 1, 1], [], []>} : vector<22x80xf32>, vector<80x32xf32>, vector<22x32xf32> -> vector<22x32xf32>
    %c0_12 = arith.constant 0 : index
    %c0_13 = arith.constant 0 : index
    %26 = vector.load %arg5[%c0_12, %c0_13] : memref<1x32xf32, #tpu.memory_space<vmem>>, vector<1x32xf32>
    %27 = vector.broadcast %26 : vector<1x32xf32> to vector<22x32xf32>
    %28 = arith.addf %25, %27 : vector<22x32xf32>
    %cst_14 = arith.constant 0.000000e+00 : f32
    %29 = vector.broadcast %cst_14 : f32 to vector<22x32xf32>
    %30 = arith.maximumf %28, %29 : vector<22x32xf32>
    %31 = vector.extract_strided_slice %30 {offsets = [0, 0], sizes = [2, 32], strides = [1, 1]} : vector<22x32xf32> to vector<2x32xf32>
    %32 = vector.extract_strided_slice %30 {offsets = [2, 0], sizes = [2, 32], strides = [1, 1]} : vector<22x32xf32> to vector<2x32xf32>
    %33 = vector.extract_strided_slice %30 {offsets = [4, 0], sizes = [2, 32], strides = [1, 1]} : vector<22x32xf32> to vector<2x32xf32>
    %34 = vector.extract_strided_slice %30 {offsets = [6, 0], sizes = [2, 32], strides = [1, 1]} : vector<22x32xf32> to vector<2x32xf32>
    %35 = vector.extract_strided_slice %30 {offsets = [8, 0], sizes = [2, 32], strides = [1, 1]} : vector<22x32xf32> to vector<2x32xf32>
    %36 = vector.extract_strided_slice %30 {offsets = [10, 0], sizes = [2, 32], strides = [1, 1]} : vector<22x32xf32> to vector<2x32xf32>
    %37 = vector.extract_strided_slice %30 {offsets = [12, 0], sizes = [2, 32], strides = [1, 1]} : vector<22x32xf32> to vector<2x32xf32>
    %38 = vector.extract_strided_slice %30 {offsets = [14, 0], sizes = [2, 32], strides = [1, 1]} : vector<22x32xf32> to vector<2x32xf32>
    %39 = vector.extract_strided_slice %30 {offsets = [16, 0], sizes = [2, 32], strides = [1, 1]} : vector<22x32xf32> to vector<2x32xf32>
    %40 = vector.extract_strided_slice %30 {offsets = [18, 0], sizes = [2, 32], strides = [1, 1]} : vector<22x32xf32> to vector<2x32xf32>
    %41 = vector.extract_strided_slice %30 {offsets = [20, 0], sizes = [2, 32], strides = [1, 1]} : vector<22x32xf32> to vector<2x32xf32>
    %42 = tpu.concatenate %31, %32, %33, %34, %35, %36, %37, %38, %39, %40, %41 in 1 : vector<2x32xf32>, vector<2x32xf32>, vector<2x32xf32>, vector<2x32xf32>, vector<2x32xf32>, vector<2x32xf32>, vector<2x32xf32>, vector<2x32xf32>, vector<2x32xf32>, vector<2x32xf32>, vector<2x32xf32> -> vector<2x352xf32>
    %c0_15 = arith.constant 0 : index
    %c0_16 = arith.constant 0 : index
    %43 = vector.load %arg6[%c0_15, %c0_16] : memref<352x128xf32, #tpu.memory_space<vmem>>, vector<352x128xf32>
    %cst_17 = arith.constant dense<0.000000e+00> : vector<2x128xf32>
    %44 = tpu.matmul %42, %43, %cst_17 {dimension_numbers = #tpu.dot_dimension_numbers<[1], [0], [0], [1], [0, 0, 1, 1], [], []>} : vector<2x352xf32>, vector<352x128xf32>, vector<2x128xf32> -> vector<2x128xf32>
    %c0_18 = arith.constant 0 : index
    %c0_19 = arith.constant 0 : index
    %45 = vector.load %arg7[%c0_18, %c0_19] : memref<1x128xf32, #tpu.memory_space<vmem>>, vector<1x128xf32>
    %46 = vector.broadcast %45 : vector<1x128xf32> to vector<2x128xf32>
    %47 = arith.addf %44, %46 : vector<2x128xf32>
    %cst_20 = arith.constant 0.000000e+00 : f32
    %48 = vector.broadcast %cst_20 : f32 to vector<2x128xf32>
    %49 = arith.maximumf %47, %48 : vector<2x128xf32>
    %c0_21 = arith.constant 0 : index
    %c0_22 = arith.constant 0 : index
    %50 = vector.load %arg8[%c0_21, %c0_22] : memref<128x128xf32, #tpu.memory_space<vmem>>, vector<128x128xf32>
    %cst_23 = arith.constant dense<0.000000e+00> : vector<2x128xf32>
    %51 = tpu.matmul %49, %50, %cst_23 {dimension_numbers = #tpu.dot_dimension_numbers<[1], [0], [0], [1], [0, 0, 1, 1], [], []>} : vector<2x128xf32>, vector<128x128xf32>, vector<2x128xf32> -> vector<2x128xf32>
    %c0_24 = arith.constant 0 : index
    %c0_25 = arith.constant 0 : index
    %52 = vector.load %arg9[%c0_24, %c0_25] : memref<1x128xf32, #tpu.memory_space<vmem>>, vector<1x128xf32>
    %53 = vector.broadcast %52 : vector<1x128xf32> to vector<2x128xf32>
    %54 = arith.addf %51, %53 : vector<2x128xf32>
    %55 = tpu.iota {dimensions = array<i32: 1>} : vector<2x128xi32>
    %c4_i32 = arith.constant 4 : i32
    %56 = vector.broadcast %c4_i32 : i32 to vector<2x128xi32>
    %57 = arith.cmpi slt, %55, %56 : vector<2x128xi32>
    %cst_26 = arith.constant -1.000000e+30 : f32
    %58 = vector.broadcast %cst_26 : f32 to vector<2x128xf32>
    %59 = arith.select %57, %54, %58 : vector<2x128xi1>, vector<2x128xf32>
    %cst_27 = arith.constant dense<0xFF800000> : vector<2xf32>
    %60 = vector.multi_reduction <maximumf>, %59, %cst_27 [1] : vector<2x128xf32> to vector<2xf32>
    %61 = vector.shape_cast %60 : vector<2xf32> to vector<2x1xf32>
    %62 = vector.broadcast %61 : vector<2x1xf32> to vector<2x128xf32>
    %63 = arith.subf %59, %62 : vector<2x128xf32>
    %64 = math.exp %63 : vector<2x128xf32>
    %cst_28 = arith.constant 0.000000e+00 : f32
    %65 = vector.broadcast %cst_28 : f32 to vector<2x128xf32>
    %66 = arith.select %57, %64, %65 : vector<2x128xi1>, vector<2x128xf32>
    %cst_29 = arith.constant dense<0.000000e+00> : vector<2xf32>
    %67 = vector.multi_reduction <add>, %66, %cst_29 [1] : vector<2x128xf32> to vector<2xf32>
    %68 = vector.shape_cast %67 : vector<2xf32> to vector<2x1xf32>
    %69 = math.log %68 : vector<2x1xf32>
    %70 = vector.broadcast %69 : vector<2x1xf32> to vector<2x128xf32>
    %71 = arith.subf %63, %70 : vector<2x128xf32>
    %c0_30 = arith.constant 0 : index
    %c0_31 = arith.constant 0 : index
    %72 = vector.load %arg10[%c0_30, %c0_31] : memref<2x128xf32, #tpu.memory_space<vmem>>, vector<2x128xf32>
    tpu.vector_store %arg10[%c0_30, %c0_31], %71 {strides = array<i32>} : memref<2x128xf32, #tpu.memory_space<vmem>>, vector<2x128xf32>,
    return
  }
}

</mosaic_0001>

<bundles_post_ra>
// kernel: forward.2
= control target key start
LH: loop header
LB: loop body
LE: loop exit
PB: predicated region body
PF: predicated region fallthrough
CT: control target
= control target key end

     0   :  { %vm70_vm0 = vcmask 1043456   ;;  %v1062_v0 = vmov 0.0   ;;  %vm1063_vm1 = vmmov 0   ;;  %vm60_vm2 = vcmask 64512   ;;  %s1066_s19 = smov 96   ;;  %s1335_s2 = inlined_call_operand.vmem [shape: bf16[8,32], index: 2, kind: input, shape index: {}]   ;;  %s1336_s1 = inlined_call_operand.vmem [shape: bf16[40,8], index: 1, kind: input, shape index: {}]   ;;  %s1337_s0 = inlined_call_operand.vmem [shape: bf16[40,40], index: 0, kind: input, shape index: {}]   ;;  %s1338_s4 = inlined_call_operand.vmem [shape: bf16[32,32], index: 4, kind: input, shape index: {}]   ;;  %s1339_s3 = inlined_call_operand.vmem [shape: f32[1,32], index: 3, kind: input, shape index: {}]   ;;  %s1340_s6 = inlined_call_operand.vmem [shape: bf16[32,32], index: 6, kind: input, shape index: {}]   ;;  %s1341_s5 = inlined_call_operand.vmem [shape: f32[1,32], index: 5, kind: input, shape index: {}]   ;;  %s1342_s8 = inlined_call_operand.vmem [shape: bf16[32,32], index: 8, kind: input, shape index: {}]   ;;  %s1343_s7 = inlined_call_operand.vmem [shape: f32[1,32], index: 7, kind: input, shape index: {}]   ;;  %s1344_s9 = inlined_call_operand.vmem [shape: f32[1,32], index: 9, kind: input, shape index: {}]   ;;  %s1345_s10 = inlined_call_operand.vmem [shape: f32[40,128], index: 10, kind: output, shape index: {}]  }
   0x1   :  { %871 = vmatprep.subr.bf16.mxu0 %v1062_v0  ;;  %v46_v1 = vld [vmem:[%s1335_s2] sm:$0xf]  ;;  %873 = vmatprep.mubr.msk.bf16.mxu0 %vm1063_vm1, %v1062_v0  ;;  %v1011_v4 = vld [vmem:[%s1336_s1 + $0x8] sm:$0xff]   ;;  %v1012_v5 = vld [vmem:[%s1336_s1 + $0x10] ss:$0 sps:$4 sm:$0xff]   ;;  %vm153_vm3 = vcmask 326656  }
   0x2   :  { %v72_v2 = vsel %vm70_vm0, %v46_v1, 0  ;;  %v1010_v3 = vld [vmem:[%s1336_s1] sm:$0xff]   ;;  %885 = vmatprep.subr.bf16.mxu1 %v1062_v0  ;;  %891 = vmatprep.mubr.msk.bf16.mxu1 %vm1063_vm1, %v1062_v0  ;;  %v1164_v23 = vld [vmem:[%s1337_s0 + $0x8] sm:$0xff]   ;;  %v1173_v24 = vld [vmem:[%s1337_s0 + $0x10] ss:$0 sps:$4 sm:$0xff]   ;;  %vm246_vm4 = vcmask 261120  }
   0x3   :  { %872 = vmatpush3.bf16.msra.mxu0 %v72_v2  ;;  %v1154_v22 = vld [vmem:[%s1337_s0] sm:$0xff]   ;;  %v1017_v26 = vld [vmem:[%s1338_s4 + $0x8] sm:$0xff]   ;;  %vm767_vm5 = vcmask 523264   ;;  %vm773_vm6 = vcmask 785408  }
   0x4   :  { %903 = vmatprep.subr.bf16.mxu0 %v1062_v0  ;;  %v1016_v25 = vld [vmem:[%s1338_s4] sm:$0xff]  }
   0x5   :  { %v794_v27 = vld [vmem:[%s1339_s3] ss:$0 sm:$0xff] }
   0x6   :  { %874 = vmatmul.mubr.msk.bf16.vlgmr.msra.gmra.mrb[0].mxu0 %vm60_vm2, %v1010_v3 }
   0x7   :  { %877 = vmatprep.mubr.msk.bf16.mxu0 %vm1063_vm1, %v1062_v0  ;;  %904 = vmatpush3.bf16.msra.mxu0 %v1016_v25 }
   0x8   :  { %905 = vmatprep.subr.bf16.mxu0 %v1062_v0 }
   0xb   :  { %906 = vmatpush3.bf16.msra.mxu0 %v1017_v26 }
   0xc   :  { %937 = vmatprep.subr.bf16.mxu0 %v1062_v0 }
   0xe   :  { %878 = vmatmul.mubr.msk.bf16.gmra.mrb[4].mxu0 %vm60_vm2, %v1011_v4 }
   0xf   :  { %881 = vmatprep.mubr.msk.bf16.mxu0 %vm1063_vm1, %v1062_v0 }
  0x16   :  { %882 = vmatmul.mubr.msk.bf16.gmra.mrb[8].mxu0 %vm60_vm2, %v1012_v5 }
  0x17   :  { %907 = vmatprep.mubr.msk.bf16.mxu0 %vm1063_vm1, %v1062_v0 }
  0xd9   :  { %v108_v6 = vpop.f32.mrb[0].mxu0 }
  0xda   :  { %v875_v7 = vpop.f32.mrb[1].mxu0 }
  0xdb   :  { %v111_v8 = vpop.f32.mrb[2].mxu0  ;;  %v1019_v7 = vld [vmem:[%s1340_s6 + $0x8] sm:$0xff]  }
  0xdc   :  { %v130_v9 = vpack.c.bf16 %v111_v8, %v108_v6  ;;  %v876_v10 = vpop.f32.mrb[3].mxu0  ;;  %v1018_v6 = vld [vmem:[%s1340_s6] sm:$0xff]   ;;  %s1064_s6 = smov 32  }
  0xdd   :  { %v806_v8 = vld [vmem:[%s1341_s5] ss:$0 sm:$0xff] }
  0xde   :  { %886 = vmatpush3.bf16.msra.mxu1 %v130_v9 }
  0xdf   :  { %887 = vmatprep.subr.bf16.mxu1 %v1062_v0 }
  0xe1   :  { %v116_v11 = vpop.f32.mrb[4].mxu0 }
  0xe2   :  { %v879_v12 = vpop.f32.mrb[5].mxu0 }
  0xe3   :  { %v119_v13 = vpop.f32.mrb[6].mxu0 }
  0xe4   :  { %v131_v14 = vpack.c.bf16 %v119_v13, %v116_v11  ;;  %v880_v15 = vpop.f32.mrb[7].mxu0 }
  0xe6   :  { %888 = vmatpush3.bf16.msra.mxu1 %v131_v14 }
  0xe7   :  { %889 = vmatprep.subr.bf16.mxu1 %v1062_v0 }
  0xe9   :  { %v124_v16 = vpop.f32.mrb[8].mxu0 }
  0xea   :  { %v132_v17 = vpack.c.bf16 %v124_v16, %v124_v16  ;;  %v883_v18 = vpop.f32.mrb[9].mxu0 }
  0xeb   :  { %v127_v19 = vpop.f32.mrb[10].mxu0 }
  0xec   :  { %v884_v20 = vpop.f32.mrb[11].mxu0  ;;  %v164_v21 = vsel %vm70_vm0, %v132_v17, 0 }
  0xed   :  { %890 = vmatpush3.bf16.msra.mxu1 %v164_v21 }
  0xee   :  { %919 = vmatprep.subr.bf16.mxu1 %v1062_v0 }
  0xf0   :  { %892 = vmatmul.mubr.msk.bf16.vlgmr.msra.gmra.mrb[0].mxu1 %vm153_vm3, %v1154_v22 }
  0xf1   :  { %895 = vmatprep.mubr.msk.bf16.mxu1 %vm1063_vm1, %v1062_v0 }
  0xf8   :  { %896 = vmatmul.mubr.msk.bf16.gmra.mrb[4].mxu1 %vm153_vm3, %v1164_v23 }
  0xf9   :  { %899 = vmatprep.mubr.msk.bf16.mxu1 %vm1063_vm1, %v1062_v0 }
 0x100   :  { %900 = vmatmul.mubr.msk.bf16.gmra.mrb[8].mxu1 %vm153_vm3, %v1173_v24 }
 0x101   :  { %925 = vmatprep.mubr.msk.bf16.mxu1 %vm1063_vm1, %v1062_v0 }
 0x1c3   :  { %v200_v28 = vpop.f32.mrb[0].mxu1 }
 0x1c4   :  { %v201_v29 = vadd.f32 %v794_v27, %v200_v28  ;;  %v893_v30 = vpop.f32.mrb[1].mxu1 }
 0x1c5   :  { %v203_v31 = vpop.f32.mrb[2].mxu1 }
 0x1c6   :  { %v204_v32 = vadd.f32 %v794_v27, %v203_v31  ;;  %v894_v33 = vpop.f32.mrb[3].mxu1  ;;  %1022 = vtanh.f32 %v201_v29 }
 0x1c8   :  { %1024 = vtanh.f32 %v204_v32 }
 0x1cb   :  { %v208_v34 = vpop.f32.mrb[4].mxu1 }
 0x1cc   :  { %v209_v35 = vadd.f32 %v794_v27, %v208_v34  ;;  %v897_v36 = vpop.f32.mrb[5].mxu1 }
 0x1cd   :  { %v211_v37 = vpop.f32.mrb[6].mxu1 }
 0x1ce   :  { %v212_v38 = vadd.f32 %v794_v27, %v211_v37  ;;  %v898_v39 = vpop.f32.mrb[7].mxu1  ;;  %1026 = vtanh.f32 %v209_v35 }
 0x1d0   :  { %1028 = vtanh.f32 %v212_v38  ;;  %v1190_v40 = vpop.eup %1022 }
 0x1d2   :  { %v1192_v41 = vpop.eup %1024 }
 0x1d3   :  { %v227_v42 = vpack.c.bf16 %v1192_v41, %v1190_v40  ;;  %v216_v43 = vpop.f32.mrb[8].mxu1 }
 0x1d4   :  { %v217_v44 = vadd.f32 %v794_v27, %v216_v43  ;;  %v901_v45 = vpop.f32.mrb[9].mxu1 }
 0x1d5   :  { %v219_v46 = vpop.f32.mrb[10].mxu1  ;;  %908 = vmatmul.mubr.msk.bf16.vlgmr.msra.gmra.mrb[12].mxu0 %vm246_vm4, %v227_v42 }
 0x1d6   :  { %1030 = vtanh.f32 %v217_v44  ;;  %v902_v47 = vpop.f32.mrb[11].mxu1  ;;  %911 = vmatprep.mubr.msk.bf16.mxu0 %vm1063_vm1, %v1062_v0  ;;  %938 = vmatpush3.bf16.msra.mxu0 %v1018_v6 }
 0x1d7   :  { %939 = vmatprep.subr.bf16.mxu0 %v1062_v0 }
 0x1d8   :  { %v1199_v48 = vpop.eup %1026 }
 0x1da   :  { %v1201_v49 = vpop.eup %1028  ;;  %940 = vmatpush3.bf16.msra.mxu0 %v1019_v7 }
 0x1db   :  { %v228_v50 = vpack.c.bf16 %v1201_v49, %v1199_v48  ;;  %971 = vmatprep.subr.bf16.mxu0 %v1062_v0 }
 0x1dd   :  { %912 = vmatmul.mubr.msk.bf16.gmra.mrb[16].mxu0 %vm246_vm4, %v228_v50 }
 0x1de   :  { %915 = vmatprep.mubr.msk.bf16.mxu0 %vm1063_vm1, %v1062_v0 }
 0x1e0   :  { %v1208_v51 = vpop.eup %1030 }
 0x1e1   :  { %v229_v52 = vpack.c.bf16 %v1208_v51, %v1208_v51 }
 0x1e5   :  { %916 = vmatmul.mubr.msk.bf16.gmra.mrb[20].mxu0 %vm246_vm4, %v229_v52 }
 0x1e6   :  { %941 = vmatprep.mubr.msk.bf16.mxu0 %vm1063_vm1, %v1062_v0 }
 0x2a8   :  { %v290_v53 = vpop.f32.mrb[12].mxu0 }
 0x2a9   :  { %v909_v54 = vpop.f32.mrb[13].mxu0 }
 0x2aa   :  { %v293_v55 = vpop.f32.mrb[14].mxu0 }
 0x2ab   :  { %v312_v56 = vpack.c.bf16 %v293_v55, %v290_v53  ;;  %v910_v57 = vpop.f32.mrb[15].mxu0 }
 0x2ad   :  { %920 = vmatpush3.bf16.msra.mxu1 %v312_v56 }
 0x2ae   :  { %921 = vmatprep.subr.bf16.mxu1 %v1062_v0 }
 0x2b0   :  { %v298_v58 = vpop.f32.mrb[16].mxu0 }
 0x2b1   :  { %v913_v59 = vpop.f32.mrb[17].mxu0 }
 0x2b2   :  { %v301_v60 = vpop.f32.mrb[18].mxu0  ;;  %v1021_v59 = vld [vmem:[%s1342_s8 + $0x8] sm:$0xff]  }
 0x2b3   :  { %v313_v61 = vpack.c.bf16 %v301_v60, %v298_v58  ;;  %v914_v62 = vpop.f32.mrb[19].mxu0  ;;  %v1020_v58 = vld [vmem:[%s1342_s8] sm:$0xff]   ;;  %s1065_s8 = smov 64  }
 0x2b4   :  { %v815_v60 = vld [vmem:[%s1343_s7] ss:$0 sm:$0xff] }
 0x2b5   :  { %922 = vmatpush3.bf16.msra.mxu1 %v313_v61 }
 0x2b6   :  { %923 = vmatprep.subr.bf16.mxu1 %v1062_v0 }
 0x2b8   :  { %v306_v63 = vpop.f32.mrb[20].mxu0 }
 0x2b9   :  { %v314_v1 = vpack.c.bf16 %v306_v63, %v306_v63  ;;  %v917_v2 = vpop.f32.mrb[21].mxu0 }
 0x2ba   :  { %v309_v3 = vpop.f32.mrb[22].mxu0 }
 0x2bb   :  { %v323_v4 = vsel %vm70_vm0, %v314_v1, 0  ;;  %v918_v5 = vpop.f32.mrb[23].mxu0 }
 0x2bc   :  { %924 = vmatpush3.bf16.msra.mxu1 %v323_v4 }
 0x2bd   :  { %953 = vmatprep.subr.bf16.mxu1 %v1062_v0 }
 0x2bf   :  { %926 = vmatmul.mubr.msk.bf16.vlgmr.msra.gmra.mrb[12].mxu1 %vm153_vm3, %v1154_v22 }
 0x2c0   :  { %929 = vmatprep.mubr.msk.bf16.mxu1 %vm1063_vm1, %v1062_v0 }
 0x2c7   :  { %930 = vmatmul.mubr.msk.bf16.gmra.mrb[16].mxu1 %vm153_vm3, %v1164_v23 }
 0x2c8   :  { %933 = vmatprep.mubr.msk.bf16.mxu1 %vm1063_vm1, %v1062_v0 }
 0x2cf   :  { %934 = vmatmul.mubr.msk.bf16.gmra.mrb[20].mxu1 %vm153_vm3, %v1173_v24 }
 0x2d0   :  { %959 = vmatprep.mubr.msk.bf16.mxu1 %vm1063_vm1, %v1062_v0 }
 0x392   :  { %v359_v9 = vpop.f32.mrb[12].mxu1 }
 0x393   :  { %v360_v10 = vadd.f32 %v806_v8, %v359_v9  ;;  %v927_v11 = vpop.f32.mrb[13].mxu1 }
 0x394   :  { %v362_v12 = vpop.f32.mrb[14].mxu1 }
 0x395   :  { %1032 = vtanh.f32 %v360_v10  ;;  %v363_v13 = vadd.f32 %v806_v8, %v362_v12  ;;  %v928_v14 = vpop.f32.mrb[15].mxu1 }
 0x397   :  { %1034 = vtanh.f32 %v363_v13 }
 0x39a   :  { %v367_v15 = vpop.f32.mrb[16].mxu1 }
 0x39b   :  { %v368_v16 = vadd.f32 %v806_v8, %v367_v15  ;;  %v931_v17 = vpop.f32.mrb[17].mxu1 }
 0x39c   :  { %v370_v18 = vpop.f32.mrb[18].mxu1 }
 0x39d   :  { %1036 = vtanh.f32 %v368_v16  ;;  %v371_v19 = vadd.f32 %v806_v8, %v370_v18  ;;  %v932_v20 = vpop.f32.mrb[19].mxu1 }
 0x39f   :  { %v1033_v21 = vpop.eup %1032  ;;  %1038 = vtanh.f32 %v371_v19 }
 0x3a0   :  { %707 = vrot.lane.b32.xlu0 %v1033_v21, %s1064_s6 }
 0x3a1   :  { %v1035_v25 = vpop.eup %1034 }
 0x3a2   :  { %v386_v26 = vpack.c.bf16 %v1035_v25, %v1033_v21  ;;  %v375_v27 = vpop.f32.mrb[20].mxu1 }
 0x3a3   :  { %v376_v28 = vadd.f32 %v806_v8, %v375_v27  ;;  %v935_v29 = vpop.f32.mrb[21].mxu1 }
 0x3a4   :  { %709 = vrot.lane.b32.xlu0 %v1035_v25, %s1064_s6  ;;  %v378_v30 = vpop.f32.mrb[22].mxu1  ;;  %942 = vmatmul.mubr.msk.bf16.vlgmr.msra.gmra.mrb[24].mxu0 %vm246_vm4, %v386_v26 }
 0x3a5   :  { %1040 = vtanh.f32 %v376_v28  ;;  %v936_v31 = vpop.f32.mrb[23].mxu1  ;;  %945 = vmatprep.mubr.msk.bf16.mxu0 %vm1063_vm1, %v1062_v0  ;;  %972 = vmatpush3.bf16.msra.mxu0 %v1020_v58 }
 0x3a6   :  { %973 = vmatprep.subr.bf16.mxu0 %v1062_v0 }
 0x3a7   :  { %v1037_v32 = vpop.eup %1036 }
 0x3a8   :  { %711 = vrot.lane.b32.xlu1 %v1037_v32, %s1064_s6 }
 0x3a9   :  { %v1039_v33 = vpop.eup %1038  ;;  %974 = vmatpush3.bf16.msra.mxu0 %v1021_v59 }
 0x3aa   :  { %v387_v34 = vpack.c.bf16 %v1039_v33, %v1037_v32 }
 0x3ac   :  { %713 = vrot.lane.b32.xlu1 %v1039_v33, %s1064_s6  ;;  %946 = vmatmul.mubr.msk.bf16.gmra.mrb[28].mxu0 %vm246_vm4, %v387_v34 }
 0x3ad   :  { %949 = vmatprep.mubr.msk.bf16.mxu0 %vm1063_vm1, %v1062_v0 }
 0x3af   :  { %v1041_v35 = vpop.eup %1040 }
 0x3b0   :  { %715 = vrot.lane.b32.xlu0 %v1041_v35, %s1064_s6  ;;  %v388_v36 = vpack.c.bf16 %v1041_v35, %v1041_v35 }
 0x3b4   :  { %950 = vmatmul.mubr.msk.bf16.gmra.mrb[32].mxu0 %vm246_vm4, %v388_v36 }
 0x3b5   :  { %975 = vmatprep.mubr.msk.bf16.mxu0 %vm1063_vm1, %v1062_v0 }
 0x477   :  { %v448_v37 = vpop.f32.mrb[24].mxu0 }
 0x478   :  { %v943_v38 = vpop.f32.mrb[25].mxu0 }
 0x479   :  { %v451_v39 = vpop.f32.mrb[26].mxu0 }
 0x47a   :  { %v470_v42 = vpack.c.bf16 %v451_v39, %v448_v37  ;;  %v944_v43 = vpop.f32.mrb[27].mxu0 }
 0x47c   :  { %954 = vmatpush3.bf16.msra.mxu1 %v470_v42 }
 0x47d   :  { %955 = vmatprep.subr.bf16.mxu1 %v1062_v0 }
 0x47f   :  { %v456_v44 = vpop.f32.mrb[28].mxu0 }
 0x480   :  { %v947_v45 = vpop.f32.mrb[29].mxu0 }
 0x481   :  { %v459_v46 = vpop.f32.mrb[30].mxu0 }
 0x482   :  { %v471_v47 = vpack.c.bf16 %v459_v46, %v456_v44  ;;  %v948_v50 = vpop.f32.mrb[31].mxu0  ;;  %v824_v44 = vld [vmem:[%s1344_s9] ss:$0 sm:$0xff] }
 0x484   :  { %956 = vmatpush3.bf16.msra.mxu1 %v471_v47 }
 0x485   :  { %957 = vmatprep.subr.bf16.mxu1 %v1062_v0 }
 0x487   :  { %v464_v52 = vpop.f32.mrb[32].mxu0 }
 0x488   :  { %v472_v53 = vpack.c.bf16 %v464_v52, %v464_v52  ;;  %v951_v54 = vpop.f32.mrb[33].mxu0 }
 0x489   :  { %v467_v55 = vpop.f32.mrb[34].mxu0 }
 0x48a   :  { %v481_v56 = vsel %vm70_vm0, %v472_v53, 0  ;;  %v952_v57 = vpop.f32.mrb[35].mxu0 }
 0x48b   :  { %958 = vmatpush3.bf16.msra.mxu1 %v481_v56 }
 0x48c   :  { %987 = vmatprep.subr.bf16.mxu1 %v1062_v0 }
 0x48e   :  { %960 = vmatmul.mubr.msk.bf16.vlgmr.msra.gmra.mrb[24].mxu1 %vm153_vm3, %v1154_v22 }
 0x48f   :  { %963 = vmatprep.mubr.msk.bf16.mxu1 %vm1063_vm1, %v1062_v0 }
 0x496   :  { %964 = vmatmul.mubr.msk.bf16.gmra.mrb[28].mxu1 %vm153_vm3, %v1164_v23 }
 0x497   :  { %967 = vmatprep.mubr.msk.bf16.mxu1 %vm1063_vm1, %v1062_v0 }
 0x49e   :  { %968 = vmatmul.mubr.msk.bf16.gmra.mrb[32].mxu1 %vm153_vm3, %v1173_v24 }
 0x49f   :  { %993 = vmatprep.mubr.msk.bf16.mxu1 %vm1063_vm1, %v1062_v0 }
 0x561   :  { %v517_v61 = vpop.f32.mrb[24].mxu1 }
 0x562   :  { %v518_v62 = vadd.f32 %v815_v60, %v517_v61  ;;  %v961_v63 = vpop.f32.mrb[25].mxu1 }
 0x563   :  { %v520_v1 = vpop.f32.mrb[26].mxu1 }
 0x564   :  { %1042 = vtanh.f32 %v518_v62  ;;  %v521_v2 = vadd.f32 %v815_v60, %v520_v1  ;;  %v962_v3 = vpop.f32.mrb[27].mxu1 }
 0x565   :  { %v708_v3 = vpop.permute.xlu0 %707 }
 0x566   :  { %1044 = vtanh.f32 %v521_v2 }
 0x569   :  { %v525_v4 = vpop.f32.mrb[28].mxu1 }
 0x56a   :  { %v526_v5 = vadd.f32 %v815_v60, %v525_v4  ;;  %v965_v6 = vpop.f32.mrb[29].mxu1  ;;  %v712_v4 = vpop.permute.xlu1 %711 }
 0x56b   :  { %v528_v7 = vpop.f32.mrb[30].mxu1 }
 0x56c   :  { %1046 = vtanh.f32 %v526_v5  ;;  %v529_v8 = vadd.f32 %v815_v60, %v528_v7  ;;  %v966_v9 = vpop.f32.mrb[31].mxu1  ;;  %v710_v5 = vpop.permute.xlu0 %709 }
 0x56e   :  { %v1043_v10 = vpop.eup %1042  ;;  %1048 = vtanh.f32 %v529_v8  ;;  %v714_v6 = vpop.permute.xlu1 %713 }
 0x56f   :  { %727 = vrot.lane.b32.xlu1 %v1043_v10, %s1065_s8 }
 0x570   :  { %v1045_v11 = vpop.eup %1044  ;;  %v716_v7 = vpop.permute.xlu0 %715 }
 0x571   :  { %v544_v12 = vpack.c.bf16 %v1045_v11, %v1043_v10  ;;  %729 = vrot.lane.b32.xlu0 %v1045_v11, %s1065_s8  ;;  %v533_v13 = vpop.f32.mrb[32].mxu1 }
 0x572   :  { %v534_v14 = vadd.f32 %v815_v60, %v533_v13  ;;  %v969_v15 = vpop.f32.mrb[33].mxu1  ;;  %v762_v13 = vsel %vm246_vm4, %v1190_v40, %v708_v3  ;;  %v764_v40 = vsel %vm246_vm4, %v1199_v48, %v712_v4  ;;  %v766_v48 = vsel %vm246_vm4, %v1208_v51, %v716_v7 }
 0x573   :  { %v536_v16 = vpop.f32.mrb[34].mxu1  ;;  %976 = vmatmul.mubr.msk.bf16.vlgmr.msra.gmra.mrb[36].mxu0 %vm246_vm4, %v544_v12 }
 0x574   :  { %1050 = vtanh.f32 %v534_v14  ;;  %v970_v17 = vpop.f32.mrb[35].mxu1  ;;  %979 = vmatprep.mubr.msk.bf16.mxu0 %vm1063_vm1, %v1062_v0  ;;  %v763_v16 = vsel %vm246_vm4, %v1192_v41, %v710_v5 }
 0x576   :  { %v1047_v18 = vpop.eup %1046 }
 0x577   :  { %731 = vrot.lane.b32.xlu1 %v1047_v18, %s1065_s8 }
 0x578   :  { %v1049_v19 = vpop.eup %1048 }
 0x579   :  { %733 = vrot.lane.b32.xlu0 %v1049_v19, %s1065_s8  ;;  %v545_v20 = vpack.c.bf16 %v1049_v19, %v1047_v18 }
 0x57b   :  { %980 = vmatmul.mubr.msk.bf16.gmra.mrb[40].mxu0 %vm246_vm4, %v545_v20 }
 0x57c   :  { %983 = vmatprep.mubr.msk.bf16.mxu0 %vm1063_vm1, %v1062_v0 }
 0x57e   :  { %v1051_v21 = vpop.eup %1050 }
 0x57f   :  { %735 = vrot.lane.b32.xlu1 %v1051_v21, %s1065_s8  ;;  %v546_v25 = vpack.c.bf16 %v1051_v21, %v1051_v21 }
 0x583   :  { %984 = vmatmul.mubr.msk.bf16.gmra.mrb[44].mxu0 %vm246_vm4, %v546_v25  ;;  %v765_v25 = vsel %vm246_vm4, %v1201_v49, %v714_v6 }
 0x5e1   :  { %v728_v8 = vpop.permute.xlu1 %727 }
 0x5e2   :  { %v768_v14 = vsel %vm767_vm5, %v762_v13, %v728_v8 }
 0x5e3   :  { %v730_v9 = vpop.permute.xlu0 %729 }
 0x5e4   :  { %v769_v18 = vsel %vm767_vm5, %v763_v16, %v730_v9 }
 0x5e9   :  { %v732_v10 = vpop.permute.xlu1 %731 }
 0x5ea   :  { %v770_v41 = vsel %vm767_vm5, %v764_v40, %v732_v10 }
 0x5eb   :  { %v734_v11 = vpop.permute.xlu0 %733 }
 0x5f1   :  { %v736_v12 = vpop.permute.xlu1 %735 }
 0x5f2   :  { %v772_v49 = vsel %vm767_vm5, %v766_v48, %v736_v12 }
 0x646   :  { %v606_v26 = vpop.f32.mrb[36].mxu0 }
 0x647   :  { %v977_v27 = vpop.f32.mrb[37].mxu0 }
 0x648   :  { %v609_v28 = vpop.f32.mrb[38].mxu0  ;;  %v771_v27 = vsel %vm767_vm5, %v765_v25, %v734_v11 }
 0x649   :  { %v628_v29 = vpack.c.bf16 %v609_v28, %v606_v26  ;;  %v978_v30 = vpop.f32.mrb[39].mxu0 }
 0x64b   :  { %988 = vmatpush3.bf16.msra.mxu1 %v628_v29 }
 0x64c   :  { %989 = vmatprep.subr.bf16.mxu1 %v1062_v0 }
 0x64e   :  { %v614_v31 = vpop.f32.mrb[40].mxu0 }
 0x64f   :  { %v981_v32 = vpop.f32.mrb[41].mxu0 }
 0x650   :  { %v617_v33 = vpop.f32.mrb[42].mxu0 }
 0x651   :  { %v629_v34 = vpack.c.bf16 %v617_v33, %v614_v31  ;;  %v982_v35 = vpop.f32.mrb[43].mxu0 }
 0x653   :  { %990 = vmatpush3.bf16.msra.mxu1 %v629_v34 }
 0x654   :  { %991 = vmatprep.subr.bf16.mxu1 %v1062_v0 }
 0x656   :  { %v622_v36 = vpop.f32.mrb[44].mxu0 }
 0x657   :  { %v630_v37 = vpack.c.bf16 %v622_v36, %v622_v36  ;;  %v985_v38 = vpop.f32.mrb[45].mxu0 }
 0x658   :  { %v625_v39 = vpop.f32.mrb[46].mxu0 }
 0x659   :  { %v639_v42 = vsel %vm70_vm0, %v630_v37, 0  ;;  %v986_v43 = vpop.f32.mrb[47].mxu0 }
 0x65a   :  { %992 = vmatpush3.bf16.msra.mxu1 %v639_v42 }
 0x65d   :  { %994 = vmatmul.mubr.msk.bf16.vlgmr.msra.gmra.mrb[36].mxu1 %vm153_vm3, %v1154_v22 }
 0x65e   :  { %997 = vmatprep.mubr.msk.bf16.mxu1 %vm1063_vm1, %v1062_v0 }
 0x665   :  { %998 = vmatmul.mubr.msk.bf16.gmra.mrb[40].mxu1 %vm153_vm3, %v1164_v23 }
 0x666   :  { %1001 = vmatprep.mubr.msk.bf16.mxu1 %vm1063_vm1, %v1062_v0 }
 0x66d   :  { %1002 = vmatmul.mubr.msk.bf16.gmra.mrb[44].mxu1 %vm153_vm3, %v1173_v24 }
 0x730   :  { %v675_v45 = vpop.f32.mrb[36].mxu1 }
 0x731   :  { %v676_v46 = vadd.f32 %v824_v44, %v675_v45  ;;  %v995_v47 = vpop.f32.mrb[37].mxu1 }
 0x732   :  { %v678_v22 = vpop.f32.mrb[38].mxu1 }
 0x733   :  { %1052 = vtanh.f32 %v676_v46  ;;  %v679_v50 = vadd.f32 %v824_v44, %v678_v22  ;;  %v996_v52 = vpop.f32.mrb[39].mxu1 }
 0x735   :  { %1054 = vtanh.f32 %v679_v50 }
 0x738   :  { %v683_v53 = vpop.f32.mrb[40].mxu1 }
 0x739   :  { %v684_v23 = vadd.f32 %v824_v44, %v683_v53  ;;  %v999_v54 = vpop.f32.mrb[41].mxu1 }
 0x73a   :  { %v686_v55 = vpop.f32.mrb[42].mxu1 }
 0x73b   :  { %1056 = vtanh.f32 %v684_v23  ;;  %v687_v0 = vadd.f32 %v824_v44, %v686_v55  ;;  %v1000_v56 = vpop.f32.mrb[43].mxu1 }
 0x73d   :  { %v1053_v24 = vpop.eup %1052  ;;  %1058 = vtanh.f32 %v687_v0 }
 0x73e   :  { %747 = vrot.lane.b32.xlu0 %v1053_v24, %s1066_s19 }
 0x73f   :  { %v1055_v57 = vpop.eup %1054 }
 0x740   :  { %749 = vrot.lane.b32.xlu1 %v1055_v57, %s1066_s19  ;;  %v691_v58 = vpop.f32.mrb[44].mxu1 }
 0x741   :  { %v692_v59 = vadd.f32 %v824_v44, %v691_v58  ;;  %v1003_v60 = vpop.f32.mrb[45].mxu1 }
 0x742   :  { %v694_v61 = vpop.f32.mrb[46].mxu1 }
 0x743   :  { %1060 = vtanh.f32 %v692_v59  ;;  %v1004_v62 = vpop.f32.mrb[47].mxu1 }
 0x745   :  { %v1057_v63 = vpop.eup %1056 }
 0x746   :  { %751 = vrot.lane.b32.xlu0 %v1057_v63, %s1066_s19 }
 0x747   :  { %v1059_v1 = vpop.eup %1058 }
 0x748   :  { %753 = vrot.lane.b32.xlu1 %v1059_v1, %s1066_s19 }
 0x74d   :  { %v1061_v2 = vpop.eup %1060 }
 0x74e   :  { %755 = vrot.lane.b32.xlu0 %v1061_v2, %s1066_s19 }
 0x7b0   :  { %v748_v15 = vpop.permute.xlu0 %747 }
 0x7b1   :  { %v774_v17 = vsel %vm773_vm6, %v768_v14, %v748_v15 }
 0x7b2   :  { %779 = vst [vmem:[%s1345_s10] sm:$0xff] %v774_v17  ;;  %v750_v19 = vpop.permute.xlu1 %749 }
 0x7b3   :  { %v775_v20 = vsel %vm773_vm6, %v769_v18, %v750_v19 }
 0x7b4   :  { %780 = vst [vmem:[%s1345_s10 + $0x8] sm:$0xff] %v775_v20 }
 0x7b8   :  { %v752_v21 = vpop.permute.xlu0 %751 }
 0x7b9   :  { %v776_v26 = vsel %vm773_vm6, %v770_v41, %v752_v21 }
 0x7ba   :  { %781 = vst [vmem:[%s1345_s10 + $0x10] sm:$0xff] %v776_v26  ;;  %v754_v28 = vpop.permute.xlu1 %753 }
 0x7bb   :  { %v777_v29 = vsel %vm773_vm6, %v771_v27, %v754_v28 }
 0x7bc   :  { %782 = vst [vmem:[%s1345_s10 + $0x18] sm:$0xff] %v777_v29 }
 0x7c0   :  { %v756_v30 = vpop.permute.xlu0 %755 }
 0x7c1   :  { %v778_v31 = vsel %vm773_vm6, %v772_v49, %v756_v30 }
 0x7c2   :  { %783 = vst [vmem:[%s1345_s10 + $0x20] sm:$0xff] %v778_v31 }

// kernel: forward.3
= control target key start
LH: loop header
LB: loop body
LE: loop exit
PB: predicated region body
PF: predicated region fallthrough
CT: control target
= control target key end

     0   :  { %v1417_v2 = vmov 0   ;;  %s1914_s0 = inlined_call_operand.vmem [shape: s32[60,1], index: 0, kind: input, shape index: {}]   ;;  %s1915_s1 = inlined_call_operand.vmem [shape: f32[40,128], index: 1, kind: input, shape index: {}]   ;;  %s1916_s2 = inlined_call_operand.vmem [shape: f32[128,16], index: 2, kind: input, shape index: {}]   ;;  %s1917_s3 = inlined_call_operand.vmem [shape: f32[1,16], index: 3, kind: input, shape index: {}]   ;;  %s1918_s4 = inlined_call_operand.vmem [shape: f32[80,32], index: 4, kind: input, shape index: {}]   ;;  %s1919_s5 = inlined_call_operand.vmem [shape: f32[1,32], index: 5, kind: input, shape index: {}]   ;;  %s1920_s6 = inlined_call_operand.vmem [shape: f32[352,128], index: 6, kind: input, shape index: {}]   ;;  %s1921_s7 = inlined_call_operand.vmem [shape: f32[1,128], index: 7, kind: input, shape index: {}]   ;;  %s1922_s8 = inlined_call_operand.vmem [shape: f32[128,128], index: 8, kind: input, shape index: {}]   ;;  %s1923_s9 = inlined_call_operand.vmem [shape: f32[1,128], index: 9, kind: input, shape index: {}]   ;;  %s1924_s10 = inlined_call_operand.hbm [shape: f32[2,128], index: 10, kind: output, shape index: {}]  }
   0x1   :  { %v38_v0 = vld [vmem:[%s1914_s0 + $0x10] sm:$0xff]  ;;  %v36_v1 = vld [vmem:[%s1914_s0] sm:$0xff]  ;;  %1373 = vset.pattern.permute.xlu1 %v1417_v2  ;;  %1372 = vset.pattern.permute.xlu0 %v1417_v2  ;;  %v39_v3 = vld [vmem:[%s1914_s0 + $0x18] sm:$0xff] }
   0x2   :  { %53 = vperm.xlu1 %1373, %v38_v0   ;;  %47 = vperm.xlu0 %1372, %v36_v1   ;;  %v37_v4 = vld [vmem:[%s1914_s0 + $0x8] sm:$0xff]  ;;  %v94_v5 = vld [vmem:[%s1915_s1] sm:$0xff]  ;;  %v96_v7 = vld [vmem:[%s1915_s1 + $0x10] sm:$0xff] }
   0x3   :  { %v95_v6 = vld [vmem:[%s1915_s1 + $0x8] sm:$0xff]  ;;  %v97_v8 = vld [vmem:[%s1915_s1 + $0x18] sm:$0xff] }
   0x4   :  { %v1233_v9 = vpack.c.bf16 %v95_v6, %v94_v5 }
   0x5   :  { %15 = vsyncpa [#allocation3], 0  ;;  %v1237_v10 = vpack.c.bf16 %v97_v8, %v96_v7  ;;  %v41_v11 = vld [vmem:[%s1914_s0 + $0x28] sm:$0xff]  ;;  %v40_v12 = vld [vmem:[%s1914_s0 + $0x20] sm:$0xff]  ;;  %v44_v19 = vlaneseq  ;;  %vm99_vm0 = vcmask 326656   ;;  %v1418_v23 = vmov 0.0  }
   0x6   :  { %56 = vperm.xlu1 %1373, %v39_v3   ;;  %50 = vperm.xlu0 %1372, %v37_v4   ;;  %v98_v13 = vld [vmem:[%s1915_s1 + $0x20] sm:$0xff]  ;;  %v43_v14 = vld [vmem:[%s1914_s0 + $0x38] sm:$0xf]  ;;  %v42_v15 = vld [vmem:[%s1914_s0 + $0x30] sm:$0xff]  ;;  %v1419_v6 = vmov 0.0|0.0   ;;  %vm370_vm9 = vcmask 1041408  }
   0x7   :  { %1234 = vmatprep.subr.bf16.mxu1 %v1233_v9  ;;  %v229_v16 = vld [vmem:[%s1916_s2] sm:$0xff]  ;;  %v230_v17 = vld [vmem:[%s1916_s2 + $0x8] sm:$0xff]  ;;  %v1527_v20 = vand.u32 127, %v44_v19  ;;  %v231_v25 = vld [vmem:[%s1916_s2 + $0x10] sm:$0xff]  ;;  %1273 = vmatprep.subr.bf16.mxu0 %v1419_v6  ;;  %vm1420_vm10 = vmmov 0   ;;  %vm391_vm11 = vcmask 1045504  }
   0x8   :  { %1236 = vmatpush3.bf16.msra.mxu1 %v1233_v9  ;;  %v1241_v18 = vpack.c.bf16 %v230_v17, %v229_v16  ;;  %v232_v26 = vld [vmem:[%s1916_s2 + $0x18] sm:$0xff]  ;;  %v233_v32 = vld [vmem:[%s1916_s2 + $0x20] sm:$0xff]  ;;  %v234_v33 = vld [vmem:[%s1916_s2 + $0x28] sm:$0xff]  ;;  %1162 = vmatprep.mubr.msk.f32.mxu0 %vm1420_vm10, %v1418_v23  ;;  %vm407_vm12 = vcmask 1043456   ;;  %s1422_s25 = smov 16   ;;  %s1423_s26 = smov 32  }
   0x9   :  { %1238 = vmatprep.subr.bf16.mxu1 %v1237_v10  ;;  %v1245_v30 = vpack.c.bf16 %v232_v26, %v231_v25  ;;  %v1249_v36 = vpack.c.bf16 %v234_v33, %v233_v32  ;;  %v235_v39 = vld [vmem:[%s1916_s2 + $0x30] sm:$0xff]  ;;  %v236_v40 = vld [vmem:[%s1916_s2 + $0x38] sm:$0xff]  ;;  %v237_v46 = vld [vmem:[%s1916_s2 + $0x40] sm:$0xff]  ;;  %vm449_vm13 = vcmask 130048   ;;  %vm453_vm14 = vcmask 261120   ;;  %s1425_s23 = smov 96  }
   0xa   :  { %62 = vperm.xlu1 %1373, %v41_v11   ;;  %59 = vperm.xlu0 %1372, %v40_v12   ;;  %v1253_v43 = vpack.c.bf16 %v236_v40, %v235_v39  ;;  %v238_v47 = vld [vmem:[%s1916_s2 + $0x48] sm:$0xff]  ;;  %v239_v50 = vld [vmem:[%s1916_s2 + $0x50] sm:$0xff]  ;;  %v240_v51 = vld [vmem:[%s1916_s2 + $0x58] sm:$0xff]  ;;  %vm457_vm15 = vcmask 392192  }
   0xb   :  { %v1257_v48 = vpack.c.bf16 %v238_v47, %v237_v46  ;;  %v1261_v52 = vpack.c.bf16 %v240_v51, %v239_v50  ;;  %v241_v53 = vld [vmem:[%s1916_s2 + $0x60] sm:$0xff]  ;;  %v242_v54 = vld [vmem:[%s1916_s2 + $0x68] sm:$0xff]  ;;  %v243_v56 = vld [vmem:[%s1916_s2 + $0x70] sm:$0xff] }
   0xc   :  { %1240 = vmatpush3.bf16.msra.mxu1 %v1237_v10  ;;  %v1265_v55 = vpack.c.bf16 %v242_v54, %v241_v53  ;;  %v244_v57 = vld [vmem:[%s1916_s2 + $0x78] sm:$0xff]  ;;  %v465_v3 = vld [vmem:[%s1918_s4] sm:$0xff]  ;;  %v466_v4 = vld [vmem:[%s1918_s4 + $0x8] sm:$0xff]  ;;  %s1424_s2 = smov 48  }
   0xd   :  { %1084 = vmatprep.subr.mxu1 %v98_v13  ;;  %v1269_v58 = vpack.c.bf16 %v244_v57, %v243_v56  ;;  %v467_v5 = vld [vmem:[%s1918_s4 + $0x10] sm:$0xff]  ;;  %v1274_v7 = vpack.c.bf16 %v466_v4, %v465_v3  ;;  %v468_v8 = vld [vmem:[%s1918_s4 + $0x18] sm:$0xff]  ;;  %v469_v10 = vld [vmem:[%s1918_s4 + $0x20] sm:$0xff] }
   0xe   :  { %68 = vperm.xlu1 %1373, %v43_v14   ;;  %65 = vperm.xlu0 %1372, %v42_v15   ;;  %v1277_v9 = vpack.c.bf16 %v468_v8, %v467_v5  ;;  %v470_v11 = vld [vmem:[%s1918_s4 + $0x28] sm:$0xff]  ;;  %v953_v16 = vld [vmem:[%s1917_s3] ss:$0 sm:$0xff]  ;;  %v472_v19 = vld [vmem:[%s1918_s4 + $0x38] sm:$0xff] }
   0xf   :  { %1275 = vmatpush3.bf16.msra.mxu0 %v1274_v7  ;;  %v1280_v12 = vpack.c.bf16 %v470_v11, %v469_v10 }
  0x10   :  { %1085 = vmatpush3.msra.mxu1 %v98_v13  ;;  %1276 = vmatprep.subr.bf16.mxu0 %v1419_v6 }
  0x11   :  { %1242 = vmatprep.subr.bf16.mxu1 %v1241_v18 }
  0x13   :  { %1278 = vmatpush3.bf16.msra.mxu0 %v1277_v9 }
  0x14   :  { %1279 = vmatprep.subr.bf16.mxu0 %v1419_v6 }
  0x17   :  { %1281 = vmatpush3.bf16.msra.mxu0 %v1280_v12 }
  0x18   :  { %1282 = vmatprep.subr.bf16.mxu0 %v1419_v6 }
  0x81   :  { %v54_v21 = vpop.permute.xlu1 %53  ;;  %v48_v22 = vpop.permute.xlu0 %47 }
  0x82   :  { %vm70_vm1 = vcmp.eq.s32.totalorder %v48_v22, %v1527_v20  ;;  %vm72_vm2 = vcmp.eq.s32.totalorder %v54_v21, %v1527_v20 }
  0x83   :  { %v937_v24 = vsel %vm70_vm1, 1.0, %v1418_v23  ;;  %v939_v29 = vsel %vm72_vm2, 1.0, %v1418_v23  ;;  %vm482_vm1 = vcmask 654336   ;;  %vm612_vm2 = vcmask 785408  }
  0x84   :  { %1086 = vmatprep.mubr.msk.f32.mxu1 %vm99_vm0, %v937_v24 }
  0x85   :  { %v57_v27 = vpop.permute.xlu1 %56  ;;  %v51_v28 = vpop.permute.xlu0 %50 }
  0x86   :  { %vm71_vm3 = vcmp.eq.s32.totalorder %v51_v28, %v1527_v20  ;;  %vm73_vm4 = vcmp.eq.s32.totalorder %v57_v27, %v1527_v20 }
  0x87   :  { %v938_v31 = vsel %vm71_vm3, 1.0, %v1418_v23  ;;  %v940_v37 = vsel %vm73_vm4, 1.0, %v1418_v23  ;;  %vm907_vm3 = vcmp.lt.s32.totalorder %v1527_v20, 4 }
  0x88   :  { %1087 = vmatmul.mubr.msk.f32.vlgmr.msra.gmra.mrb[0].mxu1 %vm99_vm0, %v938_v31 }
  0x89   :  { %v63_v34 = vpop.permute.xlu1 %62  ;;  %1089 = vmatprep.mubr.msk.f32.mxu1 %vm99_vm0, %v939_v29  ;;  %v60_v35 = vpop.permute.xlu0 %59  ;;  %1244 = vmatpush3.bf16.msra.mxu1 %v1241_v18  ;;  %v471_v18 = vld [vmem:[%s1918_s4 + $0x30] sm:$0xff]  ;;  %v473_v29 = vld [vmem:[%s1918_s4 + $0x40] sm:$0xff] }
  0x8a   :  { %vm74_vm5 = vcmp.eq.s32.totalorder %v60_v35, %v1527_v20  ;;  %1246 = vmatprep.subr.bf16.mxu1 %v1245_v30  ;;  %vm75_vm6 = vcmp.eq.s32.totalorder %v63_v34, %v1527_v20  ;;  %v1283_v22 = vpack.c.bf16 %v472_v19, %v471_v18 }
  0x8b   :  { %v941_v38 = vsel %vm74_vm5, 1.0, %v1418_v23  ;;  %v942_v44 = vsel %vm75_vm6, 1.0, %v1418_v23 }
  0x8c   :  { %1090 = vmatmul.mubr.msk.f32.gmra.mrb[2].mxu1 %vm99_vm0, %v940_v37  ;;  %1284 = vmatpush3.bf16.msra.mxu0 %v1283_v22 }
  0x8d   :  { %v69_v41 = vpop.permute.xlu1 %68  ;;  %1092 = vmatprep.mubr.msk.f32.mxu1 %vm99_vm0, %v941_v38  ;;  %v66_v42 = vpop.permute.xlu0 %65  ;;  %1248 = vmatpush3.bf16.msra.mxu1 %v1245_v30  ;;  %v474_v30 = vld [vmem:[%s1918_s4 + $0x48] sm:$0xff]  ;;  %s1421_s4 = smov 64  }
  0x8e   :  { %vm76_vm7 = vcmp.eq.s32.totalorder %v66_v42, %v1527_v20  ;;  %1250 = vmatprep.subr.bf16.mxu1 %v1249_v36  ;;  %vm77_vm8 = vcmp.eq.s32.totalorder %v69_v41, %v1527_v20  ;;  %1285 = vmatprep.subr.bf16.mxu0 %v1419_v6  ;;  %v1286_v34 = vpack.c.bf16 %v474_v30, %v473_v29 }
  0x8f   :  { %v943_v45 = vsel %vm76_vm7, 1.0, %v1418_v23  ;;  %v944_v49 = vsel %vm77_vm8, 1.0, %v1418_v23 }
  0x90   :  { %1093 = vmatmul.mubr.msk.f32.gmra.mrb[4].mxu1 %vm99_vm0, %v942_v44  ;;  %1287 = vmatpush3.bf16.msra.mxu0 %v1286_v34 }
  0x91   :  { %1095 = vmatprep.mubr.msk.f32.mxu1 %vm99_vm0, %v943_v45  ;;  %1252 = vmatpush3.bf16.msra.mxu1 %v1249_v36 }
  0x92   :  { %1254 = vmatprep.subr.bf16.mxu1 %v1253_v43 }
  0x94   :  { %1096 = vmatmul.mubr.msk.f32.gmra.mrb[6].mxu1 %vm99_vm0, %v944_v49  ;;  %vm461_vm0 = vcmask 523264  }
  0x95   :  { %1256 = vmatpush3.bf16.msra.mxu1 %v1253_v43 }
  0x96   :  { %1258 = vmatprep.subr.bf16.mxu1 %v1257_v48 }
  0x99   :  { %1260 = vmatpush3.bf16.msra.mxu1 %v1257_v48 }
  0x9a   :  { %1262 = vmatprep.subr.bf16.mxu1 %v1261_v52 }
  0x9d   :  { %1264 = vmatpush3.bf16.msra.mxu1 %v1261_v52 }
  0x9e   :  { %1266 = vmatprep.subr.bf16.mxu1 %v1265_v55 }
  0xa1   :  { %1268 = vmatpush3.bf16.msra.mxu1 %v1265_v55 }
  0xa2   :  { %1270 = vmatprep.subr.bf16.mxu1 %v1269_v58 }
  0xa5   :  { %1272 = vmatpush3.bf16.msra.mxu1 %v1269_v58 }
  0xa6   :  { %1338 = vmatprep.subr.bf16.mxu1 %v1419_v6 }
 0x15b   :  { %v1088_v59 = vpop.f32.mrb[0].mxu1 }
 0x15c   :  { %v190_v60 = vpop.f32.mrb[1].mxu1 }
 0x15d   :  { %1130 = vmatprep.mubr.f32.mxu1 %v190_v60 }
 0x15e   :  { %1131 = vmatmul.mubr.f32.vlgmr.msra.gmra.mrb[8].mxu1 %v1088_v59 }
 0x15f   :  { %v1091_v61 = vpop.f32.mrb[2].mxu1 }
 0x160   :  { %v200_v62 = vpop.f32.mrb[3].mxu1 }
 0x161   :  { %1133 = vmatprep.mubr.f32.mxu1 %v200_v62 }
 0x162   :  { %1134 = vmatmul.mubr.f32.gmra.mrb[10].mxu1 %v1091_v61 }
 0x163   :  { %v1094_v63 = vpop.f32.mrb[4].mxu1 }
 0x164   :  { %v210_v0 = vpop.f32.mrb[5].mxu1 }
 0x165   :  { %1136 = vmatprep.mubr.f32.mxu1 %v210_v0 }
 0x166   :  { %1137 = vmatmul.mubr.f32.gmra.mrb[12].mxu1 %v1094_v63 }
 0x167   :  { %v1097_v1 = vpop.f32.mrb[6].mxu1 }
 0x168   :  { %v220_v2 = vpop.f32.mrb[7].mxu1 }
 0x169   :  { %1139 = vmatprep.mubr.f32.mxu1 %v220_v2 }
 0x16a   :  { %1140 = vmatmul.mubr.f32.gmra.mrb[14].mxu1 %v1097_v1 }
 0x16b   :  { %1230 = vmatprep.mubr.msk.f32.mxu1 %vm1420_vm10, %v1418_v23 }
 0x231   :  { %v1132_v13 = vpop.f32.mrb[8].mxu1 }
 0x232   :  { %v318_v14 = vpop.f32.mrb[9].mxu1  ;;  %v324_v31 = vadd.f32 %v1132_v13, %v953_v16 }
 0x233   :  { %v319_v32 = vadd.f32 %v953_v16, %v318_v14 }
 0x234   :  { %v358_v44 = vmax.f32 %v324_v31, 0.0 }
 0x235   :  { %v1135_v15 = vpop.f32.mrb[10].mxu1  ;;  %v357_v45 = vmax.f32 %v319_v32, 0.0 }
 0x236   :  { %v328_v17 = vpop.f32.mrb[11].mxu1  ;;  %v334_v21 = vadd.f32 %v1135_v15, %v953_v16 }
 0x237   :  { %v329_v41 = vadd.f32 %v953_v16, %v328_v17 }
 0x238   :  { %v360_v27 = vmax.f32 %v334_v21, 0.0 }
 0x239   :  { %v1138_v24 = vpop.f32.mrb[12].mxu1  ;;  %v359_v53 = vmax.f32 %v329_v41, 0.0  ;;  %v635_v41 = vld [vmem:[%s1920_s6 + $0x80] sm:$0xff] }
 0x23a   :  { %v344_v25 = vadd.f32 %v1138_v24, %v953_v16  ;;  %v338_v26 = vpop.f32.mrb[13].mxu1  ;;  %v371_v40 = vrot.slane %v360_v27, 6 }
 0x23b   :  { %v339_v28 = vadd.f32 %v953_v16, %v338_v26 }
 0x23c   :  { %v362_v33 = vmax.f32 %v344_v25, 0.0 }
 0x23d   :  { %v361_v35 = vmax.f32 %v339_v28, 0.0  ;;  %v1141_v36 = vpop.f32.mrb[14].mxu1 }
 0x23e   :  { %v374_v37 = vrot.slane %v362_v33, 6  ;;  %v354_v38 = vadd.f32 %v1141_v36, %v953_v16  ;;  %v348_v39 = vpop.f32.mrb[15].mxu1 }
 0x23f   :  { %v372_v42 = vrot.slane %v361_v35, 6  ;;  %v349_v43 = vadd.f32 %v953_v16, %v348_v39 }
 0x240   :  { %v364_v46 = vmax.f32 %v354_v38, 0.0 }
 0x241   :  { %v373_v47 = vsel %vm370_vm9, %v371_v40, %v372_v42  ;;  %v375_v48 = vsel %vm370_vm9, %v372_v42, %v374_v37  ;;  %v363_v49 = vmax.f32 %v349_v43, 0.0  ;;  %v636_v42 = vld [vmem:[%s1920_s6 + $0x88] sm:$0xff]  ;;  %v619_v43 = vld [vmem:[%s1920_s6] sm:$0xff] }
 0x242   :  { %v384_v50 = vmax.f32 %v357_v45, %v373_v47  ;;  %v1640_v51 = vmax.f32 %v358_v44, %v375_v48  ;;  %v378_v52 = vrot.slane %v364_v46, 6  ;;  %v1288_v44 = vpack.c.bf16 %v636_v42, %v635_v41  ;;  %v620_v45 = vld [vmem:[%s1920_s6 + $0x8] sm:$0xff]  ;;  %v637_v46 = vld [vmem:[%s1920_s6 + $0x90] sm:$0xff]  ;;  %v638_v47 = vld [vmem:[%s1920_s6 + $0x98] sm:$0xff] }
 0x243   :  { %v376_v54 = vrot.slane %v363_v49, 6  ;;  %v1290_v48 = vpack.c.bf16 %v620_v45, %v619_v43  ;;  %v1292_v49 = vpack.c.bf16 %v638_v47, %v637_v46 }
 0x244   :  { %440 = vrot.lane.b32.xlu1 %v1640_v51, %s1421_s4  ;;  %v392_v55 = vrot.slane %v384_v50, 2  ;;  %v393_v56 = vrot.slane %v1640_v51, 2  ;;  %v408_v57 = vrot.slane %v384_v50, 4  ;;  %v409_v58 = vrot.slane %v1640_v51, 4  ;;  %1289 = vmatprep.subr.bf16.mxu0 %v1288_v44 }
 0x245   :  { %v377_v59 = vsel %vm370_vm9, %v374_v37, %v376_v54  ;;  %v379_v60 = vsel %vm370_vm9, %v376_v54, %v378_v52  ;;  %v424_v61 = vrot.slane %v384_v50, 6  ;;  %v425_v62 = vrot.slane %v1640_v51, 6  ;;  %v639_v52 = vld [vmem:[%s1920_s6 + $0xa0] sm:$0xff] }
 0x246   :  { %v386_v63 = vmax.f32 %v359_v53, %v377_v59  ;;  %v387_v0 = vmax.f32 %v360_v27, %v379_v60  ;;  %v394_v1 = vsel %vm391_vm11, %v392_v55, %v393_v56  ;;  %v410_v2 = vsel %vm407_vm12, %v408_v57, %v409_v58  ;;  %v640_v53 = vld [vmem:[%s1920_s6 + $0xa8] sm:$0xff]  ;;  %v642_v59 = vld [vmem:[%s1920_s6 + $0xb8] sm:$0xff] }
 0x247   :  { %397 = vrot.lane.b32.xlu0 %v394_v1, %s1422_s25  ;;  %v426_v4 = vsel %vm370_vm9, %v424_v61, %v425_v62  ;;  %v1296_v55 = vpack.c.bf16 %v640_v53, %v639_v52  ;;  %v624_v57 = vld [vmem:[%s1920_s6 + $0x28] sm:$0xff]  ;;  %v814_v52 = vld [vmem:[%s1922_s8] sm:$0xff] }
 0x248   :  { %415 = vrot.lane.b32.xlu1 %v410_v2, %s1423_s26  ;;  %v411_v3 = vrot.slane %v386_v63, 4  ;;  %v395_v7 = vrot.slane %v386_v63, 2  ;;  %v427_v9 = vrot.slane %v386_v63, 6  ;;  %v413_v10 = vrot.slane %v387_v0, 4  ;;  %v644_v1 = vld [vmem:[%s1920_s6 + $0xc8] sm:$0xff] }
 0x249   :  { %v429_v13 = vrot.slane %v387_v0, 6  ;;  %v815_v53 = vld [vmem:[%s1922_s8 + $0x8] sm:$0xff] }
 0x24a   :  { %v412_v5 = vsel %vm407_vm12, %v409_v58, %v411_v3  ;;  %v396_v8 = vsel %vm391_vm11, %v393_v56, %v395_v7  ;;  %v428_v11 = vsel %vm370_vm9, %v425_v62, %v427_v9  ;;  %v414_v12 = vsel %vm407_vm12, %v411_v3, %v413_v10  ;;  %v623_v56 = vld [vmem:[%s1920_s6 + $0x20] sm:$0xff]  ;;  %v641_v58 = vld [vmem:[%s1920_s6 + $0xb0] sm:$0xff] }
 0x24b   :  { %431 = vrot.lane.b32.xlu0 %v426_v4, %s1424_s2  ;;  %v430_v14 = vsel %vm370_vm9, %v427_v9, %v429_v13  ;;  %v1298_v60 = vpack.c.bf16 %v624_v57, %v623_v56  ;;  %v1300_v61 = vpack.c.bf16 %v642_v59, %v641_v58  ;;  %v625_v62 = vld [vmem:[%s1920_s6 + $0x30] sm:$0xff]  ;;  %v627_v4 = vld [vmem:[%s1920_s6 + $0x40] sm:$0xff] }
 0x24c   :  { %417 = vrot.lane.b32.xlu1 %v412_v5, %s1423_s26  ;;  %v628_v5 = vld [vmem:[%s1920_s6 + $0x48] sm:$0xff]  ;;  %v647_v13 = vld [vmem:[%s1920_s6 + $0xe0] sm:$0xff] }
 0x24d   :  { %v1306_v9 = vpack.c.bf16 %v628_v5, %v627_v4 }
 0x24f   :  { %399 = vrot.lane.b32.xlu0 %v396_v8, %s1422_s25  ;;  %v646_v8 = vld [vmem:[%s1920_s6 + $0xd8] sm:$0xff] }
 0x250   :  { %442 = vrot.lane.b32.xlu1 %v386_v63, %s1421_s4 }
 0x253   :  { %433 = vrot.lane.b32.xlu0 %v428_v11, %s1424_s2  ;;  %v629_v11 = vld [vmem:[%s1920_s6 + $0x50] sm:$0xff] }
 0x254   :  { %419 = vrot.lane.b32.xlu1 %v414_v12, %s1423_s26  ;;  %v630_v12 = vld [vmem:[%s1920_s6 + $0x58] sm:$0xff] }
 0x257   :  { %401 = vrot.lane.b32.xlu0 %v395_v7, %s1422_s25  ;;  %v645_v7 = vld [vmem:[%s1920_s6 + $0xd0] sm:$0xff] }
 0x258   :  { %444 = vrot.lane.b32.xlu1 %v387_v0, %s1421_s4  ;;  %v643_v0 = vld [vmem:[%s1920_s6 + $0xc0] sm:$0xff]  ;;  %v1308_v10 = vpack.c.bf16 %v646_v8, %v645_v7 }
 0x259   :  { %v1304_v3 = vpack.c.bf16 %v644_v1, %v643_v0  ;;  %v652_v0 = vld [vmem:[%s1920_s6 + $0x108] sm:$0xff] }
 0x25b   :  { %435 = vrot.lane.b32.xlu0 %v430_v14, %s1424_s2  ;;  %v648_v14 = vld [vmem:[%s1920_s6 + $0xe8] sm:$0xff] }
 0x2b6   :  { %v441_v15 = vpop.permute.xlu1 %440 }
 0x2b9   :  { %v398_v16 = vpop.permute.xlu0 %397 }
 0x2ba   :  { %v450_v17 = vsel %vm449_vm13, %v384_v50, %v398_v16  ;;  %v416_v18 = vpop.permute.xlu1 %415  ;;  %v621_v50 = vld [vmem:[%s1920_s6 + $0x10] sm:$0xff]  ;;  %v1312_v16 = vpack.c.bf16 %v648_v14, %v647_v13  ;;  %v655_v13 = vld [vmem:[%s1920_s6 + $0x120] sm:$0xff]  ;;  %v656_v14 = vld [vmem:[%s1920_s6 + $0x128] sm:$0xff] }
 0x2bb   :  { %v454_v19 = vsel %vm453_vm14, %v450_v17, %v416_v18 }
 0x2bd   :  { %v432_v21 = vpop.permute.xlu0 %431 }
 0x2be   :  { %v458_v22 = vsel %vm457_vm15, %v454_v19, %v432_v21  ;;  %v418_v24 = vpop.permute.xlu1 %417  ;;  %v954_v19 = vld [vmem:[%s1919_s5] ss:$0 sm:$0xff] }
 0x2bf   :  { %v462_v25 = vsel %vm461_vm0, %v458_v22, %v441_v15  ;;  %v1310_v15 = vpack.c.bf16 %v630_v12, %v629_v11  ;;  %v631_v21 = vld [vmem:[%s1920_s6 + $0x60] sm:$0xff]  ;;  %v632_v22 = vld [vmem:[%s1920_s6 + $0x68] sm:$0xff]  ;;  %v654_v11 = vld [vmem:[%s1920_s6 + $0x118] sm:$0xff] }
 0x2c0   :  { %1163 = vmatmul.mubr.msk.f32.vlgmr.msra.gmra.mrb[0].mxu0 %vm482_vm1, %v462_v25 }
 0x2c1   :  { %v400_v26 = vpop.permute.xlu0 %399  ;;  %1165 = vmatprep.mubr.msk.f32.mxu0 %vm1420_vm10, %v1418_v23  ;;  %1291 = vmatpush3.bf16.msra.mxu0 %v1290_v48 }
 0x2c2   :  { %v451_v27 = vsel %vm449_vm13, %v1640_v51, %v400_v26  ;;  %v443_v28 = vpop.permute.xlu1 %442  ;;  %v622_v51 = vld [vmem:[%s1920_s6 + $0x18] sm:$0xff]  ;;  %1293 = vmatprep.subr.bf16.mxu0 %v1292_v49  ;;  %v649_v26 = vld [vmem:[%s1920_s6 + $0xf0] sm:$0xff] }
 0x2c3   :  { %v455_v29 = vsel %vm453_vm14, %v451_v27, %v418_v24  ;;  %v1294_v54 = vpack.c.bf16 %v622_v51, %v621_v50  ;;  %v1314_v24 = vpack.c.bf16 %v632_v22, %v631_v21  ;;  %v650_v27 = vld [vmem:[%s1920_s6 + $0xf8] sm:$0xff]  ;;  %v661_v22 = vld [vmem:[%s1920_s6 + $0x150] sm:$0xff] }
 0x2c5   :  { %v434_v30 = vpop.permute.xlu0 %433  ;;  %1295 = vmatpush3.bf16.msra.mxu0 %v1294_v54  ;;  %v1339_v54 = vpack.c.bf16 %v815_v53, %v814_v52 }
 0x2c6   :  { %v459_v31 = vsel %vm457_vm15, %v455_v29, %v434_v30  ;;  %v420_v33 = vpop.permute.xlu1 %419  ;;  %1297 = vmatprep.subr.bf16.mxu0 %v1296_v55  ;;  %v633_v29 = vld [vmem:[%s1920_s6 + $0x70] sm:$0xff]  ;;  %v634_v30 = vld [vmem:[%s1920_s6 + $0x78] sm:$0xff] }
 0x2c7   :  { %v463_v32 = vsel %vm461_vm0, %v459_v31, %v443_v28  ;;  %v1316_v28 = vpack.c.bf16 %v650_v27, %v649_v26  ;;  %v1318_v31 = vpack.c.bf16 %v634_v30, %v633_v29  ;;  %1340 = vmatpush3.bf16.msra.mxu1 %v1339_v54  ;;  %v816_v30 = vld [vmem:[%s1922_s8 + $0x10] sm:$0xff]  ;;  %v958_v54 = vld [vmem:[%s1921_s7] ss:$0 sm:$0xff]  ;;  %s1426_s7 = smov [#allocation2]  }
 0x2c8   :  { %1166 = vmatmul.mubr.msk.f32.gmra.mrb[2].mxu0 %vm482_vm1, %v463_v32  ;;  %1341 = vmatprep.subr.bf16.mxu1 %v1419_v6 }
 0x2c9   :  { %v402_v34 = vpop.permute.xlu0 %401  ;;  %1168 = vmatprep.mubr.msk.f32.mxu0 %vm1420_vm10, %v1418_v23  ;;  %1299 = vmatpush3.bf16.msra.mxu0 %v1298_v60 }
 0x2ca   :  { %v452_v35 = vsel %vm449_vm13, %v386_v63, %v402_v34  ;;  %v445_v38 = vpop.permute.xlu1 %444  ;;  %v626_v63 = vld [vmem:[%s1920_s6 + $0x38] sm:$0xff]  ;;  %1301 = vmatprep.subr.bf16.mxu0 %v1300_v61 }
 0x2cb   :  { %v456_v36 = vsel %vm453_vm14, %v452_v35, %v420_v33  ;;  %v1302_v2 = vpack.c.bf16 %v626_v63, %v625_v62  ;;  %v651_v63 = vld [vmem:[%s1920_s6 + $0x100] sm:$0xff] }
 0x2cc   :  { %v1321_v7 = vpack.c.bf16 %v652_v0, %v651_v63 }
 0x2cd   :  { %v436_v37 = vpop.permute.xlu0 %435  ;;  %1303 = vmatpush3.bf16.msra.mxu0 %v1302_v2 }
 0x2ce   :  { %v460_v39 = vsel %vm457_vm15, %v456_v36, %v436_v37  ;;  %1305 = vmatprep.subr.bf16.mxu0 %v1304_v3 }
 0x2cf   :  { %v464_v40 = vsel %vm461_vm0, %v460_v39, %v445_v38 }
 0x2d0   :  { %1169 = vmatmul.mubr.msk.f32.gmra.mrb[4].mxu0 %vm482_vm1, %v464_v40 }
 0x2d1   :  { %1307 = vmatpush3.bf16.msra.mxu0 %v1306_v9 }
 0x2d2   :  { %1309 = vmatprep.subr.bf16.mxu0 %v1308_v10  ;;  %v653_v10 = vld [vmem:[%s1920_s6 + $0x110] sm:$0xff] }
 0x2d3   :  { %v1324_v12 = vpack.c.bf16 %v654_v11, %v653_v10 }
 0x2d5   :  { %1311 = vmatpush3.bf16.msra.mxu0 %v1310_v15  ;;  %v1327_v15 = vpack.c.bf16 %v656_v14, %v655_v13 }
 0x2d6   :  { %1313 = vmatprep.subr.bf16.mxu0 %v1312_v16  ;;  %v657_v16 = vld [vmem:[%s1920_s6 + $0x130] sm:$0xff] }
 0x2d9   :  { %1315 = vmatpush3.bf16.msra.mxu0 %v1314_v24  ;;  %v662_v24 = vld [vmem:[%s1920_s6 + $0x158] sm:$0xff] }
 0x2da   :  { %1317 = vmatprep.subr.bf16.mxu0 %v1316_v28  ;;  %v1336_v26 = vpack.c.bf16 %v662_v24, %v661_v22 }
 0x2dd   :  { %1319 = vmatpush3.bf16.msra.mxu0 %v1318_v31  ;;  %v817_v31 = vld [vmem:[%s1922_s8 + $0x18] sm:$0xff] }
 0x2de   :  { %1320 = vmatprep.subr.bf16.mxu0 %v1419_v6 }
 0x393   :  { %v558_v17 = vpop.f32.mrb[0].mxu0 }
 0x394   :  { %v1164_v18 = vpop.f32.mrb[1].mxu0  ;;  %v559_v25 = vadd.f32 %v954_v19, %v558_v17 }
 0x395   :  { %v659_v18 = vld [vmem:[%s1920_s6 + $0x140] sm:$0xff] }
 0x396   :  { %v572_v33 = vmax.f32 %v559_v25, 0.0 }
 0x398   :  { %v580_v37 = vrot.slane %v572_v33, 4  ;;  %v576_v39 = vrot.slane %v572_v33, 2  ;;  %v584_v47 = vrot.slane %v572_v33, 6 }
 0x39b   :  { %v563_v32 = vpop.f32.mrb[2].mxu0 }
 0x39c   :  { %v564_v34 = vadd.f32 %v954_v19, %v563_v32  ;;  %v1167_v35 = vpop.f32.mrb[3].mxu0  ;;  %v1342_v32 = vpack.c.bf16 %v817_v31, %v816_v30 }
 0x39e   :  { %v573_v36 = vmax.f32 %v564_v34, 0.0  ;;  %1343 = vmatpush3.bf16.msra.mxu1 %v1342_v32  ;;  %v819_v34 = vld [vmem:[%s1922_s8 + $0x28] sm:$0xff] }
 0x39f   :  { %1344 = vmatprep.subr.bf16.mxu1 %v1419_v6 }
 0x3a0   :  { %v593_v38 = vrot.slane %v573_v36, 4  ;;  %v589_v40 = vrot.slane %v573_v36, 2  ;;  %v597_v43 = vrot.slane %v573_v36, 6 }
 0x3a2   :  { %v1379_v41 = vpack.i.bf16 %v580_v37, %v593_v38  ;;  %v1374_v42 = vpack.i.bf16 %v576_v39, %v589_v40  ;;  %v1384_v49 = vpack.i.bf16 %v584_v47, %v597_v43  ;;  %v821_v37 = vld [vmem:[%s1922_s8 + $0x38] sm:$0xff]  ;;  %v822_v39 = vld [vmem:[%s1922_s8 + $0x40] sm:$0xff]  ;;  %v823_v40 = vld [vmem:[%s1922_s8 + $0x48] sm:$0xff] }
 0x3a3   :  { %v568_v44 = vpop.f32.mrb[4].mxu0  ;;  %v825_v43 = vld [vmem:[%s1922_s8 + $0x58] sm:$0xff] }
 0x3a4   :  { %v569_v45 = vadd.f32 %v954_v19, %v568_v44  ;;  %1380 = vrot.lane.b32.xlu1 %v1379_v41, %s1421_s4  ;;  %1375 = vrot.lane.b32.xlu0 %v1374_v42, %s1423_s26  ;;  %v1170_v46 = vpop.f32.mrb[5].mxu0  ;;  %v660_v19 = vld [vmem:[%s1920_s6 + $0x148] sm:$0xff]  ;;  %v1351_v41 = vpack.c.bf16 %v823_v40, %v822_v39  ;;  %v824_v42 = vld [vmem:[%s1922_s8 + $0x50] sm:$0xff] }
 0x3a5   :  { %v1333_v21 = vpack.c.bf16 %v660_v19, %v659_v18  ;;  %v1354_v44 = vpack.c.bf16 %v825_v43, %v824_v42  ;;  %v827_v46 = vld [vmem:[%s1922_s8 + $0x68] sm:$0xff] }
 0x3a6   :  { %v574_v48 = vmax.f32 %v569_v45, 0.0  ;;  %v826_v45 = vld [vmem:[%s1922_s8 + $0x60] sm:$0xff] }
 0x3a7   :  { %v1357_v47 = vpack.c.bf16 %v827_v46, %v826_v45 }
 0x3a8   :  { %1385 = vrot.lane.b32.xlu0 %v1384_v49, %s1425_s23  ;;  %v602_v50 = vrot.slane %v574_v48, 2  ;;  %v606_v51 = vrot.slane %v574_v48, 4  ;;  %v829_v49 = vld [vmem:[%s1922_s8 + $0x78] sm:$0xff] }
 0x3aa   :  { %603 = vrot.lane.b32.xlu1 %v602_v50, %s1423_s26 }
 0x3ac   :  { %607 = vrot.lane.b32.xlu0 %v606_v51, %s1421_s4 }
 0x416   :  { %v1381_v55 = vpop.permute.xlu1 %1380  ;;  %v1376_v56 = vpop.permute.xlu0 %1375 }
 0x417   :  { %v1378_v57 = vunpack.i.h.bf16 %v1376_v56  ;;  %v1377_v58 = vunpack.i.l.bf16 %v1376_v56  ;;  %v1383_v59 = vunpack.i.h.bf16 %v1381_v55  ;;  %v1382_v60 = vunpack.i.l.bf16 %v1381_v55 }
 0x419   :  { %v610_v61 = vsel %vm453_vm14, %v572_v33, %v1378_v57  ;;  %v614_v62 = vsel %vm453_vm14, %v573_v36, %v1377_v58  ;;  %v818_v33 = vld [vmem:[%s1922_s8 + $0x20] sm:$0xff]  ;;  %v820_v36 = vld [vmem:[%s1922_s8 + $0x30] sm:$0xff] }
 0x41a   :  { %v1386_v1 = vpop.permute.xlu0 %1385  ;;  %v615_v4 = vsel %vm461_vm0, %v614_v62, %v1382_v60  ;;  %v611_v5 = vsel %vm461_vm0, %v610_v61, %v1383_v59  ;;  %v1345_v35 = vpack.c.bf16 %v819_v34, %v818_v33  ;;  %v1348_v38 = vpack.c.bf16 %v821_v37, %v820_v36  ;;  %v960_v59 = vld [vmem:[%s1923_s9] ss:$0 sm:$0xff] }
 0x41b   :  { %v1388_v2 = vunpack.i.h.bf16 %v1386_v1  ;;  %v1387_v3 = vunpack.i.l.bf16 %v1386_v1 }
 0x41c   :  { %v604_v25 = vpop.permute.xlu1 %603  ;;  %1346 = vmatpush3.bf16.msra.mxu1 %v1345_v35 }
 0x41d   :  { %v616_v8 = vsel %vm612_vm2, %v615_v4, %v1387_v3  ;;  %v613_v9 = vsel %vm612_vm2, %v611_v5, %v1388_v2  ;;  %v617_v27 = vsel %vm453_vm14, %v574_v48, %v604_v25  ;;  %1347 = vmatprep.subr.bf16.mxu1 %v1419_v6  ;;  %v828_v48 = vld [vmem:[%s1922_s8 + $0x70] sm:$0xff]  ;;  %s929_s8 = sshll.u32 %s1426_s7, 4  ;;  %s930_s8 = int_to_ptr.vmem [resolvable:$true] %s929_s8 }
 0x41e   :  { %737 = vmatprep.mubr.f32.mxu0 %v616_v8  ;;  %v608_v28 = vpop.permute.xlu0 %607  ;;  %v1360_v50 = vpack.c.bf16 %v829_v49, %v828_v48  ;;  %s1393_s9 = scalar_lea.vmem %s930_s8, 32  ;;  %p1398_p1 = scmp.lt.s32.totalorder %s930_s8, %s930_s8 }
 0x41f   :  { %738 = vmatmul.mubr.f32.vlgmr.msra.gmra.mrb[6].mxu0 %v613_v9  ;;  %v618_v29 = vsel %vm461_vm0, %v617_v27, %v608_v28  ;;  %p1394_p0 = scmp.ne.s32.totalorder %s930_s8, %s1393_s9  ;;  %p1399_p2 = scmp.lt.s32.totalorder %s1393_s9, %s1393_s9 }
 0x420   :  { %1322 = vmatpush3.bf16.msra.mxu0 %v1321_v7  ;;  %1195 = vmatprep.mubr.msk.f32.mxu0 %vm1420_vm10, %v1418_v23  ;;  %v658_v23 = vld [vmem:[%s1920_s6 + $0x138] sm:$0xff] }
 0x421   :  { %1323 = vmatprep.subr.bf16.mxu0 %v1419_v6  ;;  %v1330_v17 = vpack.c.bf16 %v658_v23, %v657_v16  ;;  %1349 = vmatpush3.bf16.msra.mxu1 %v1348_v38  ;;  %p1400_p3 = por %p1399_p2, %p1398_p1 }
 0x422   :  { %1350 = vmatprep.subr.bf16.mxu1 %v1419_v6 }
 0x423   :  { %p1401_p4 = pnand %p1400_p3, %p1394_p0 }
 0x424   :  { %1325 = vmatpush3.bf16.msra.mxu0 %v1324_v12 }
 0x425   :  { %1326 = vmatprep.subr.bf16.mxu0 %v1419_v6  ;;  %1352 = vmatpush3.bf16.msra.mxu1 %v1351_v41 }
 0x426   :  { %1353 = vmatprep.subr.bf16.mxu1 %v1419_v6 }
 0x428   :  { %1328 = vmatpush3.bf16.msra.mxu0 %v1327_v15 }
 0x429   :  { %1329 = vmatprep.subr.bf16.mxu0 %v1419_v6  ;;  %1355 = vmatpush3.bf16.msra.mxu1 %v1354_v44 }
 0x42a   :  { %1356 = vmatprep.subr.bf16.mxu1 %v1419_v6 }
 0x42c   :  { %1331 = vmatpush3.bf16.msra.mxu0 %v1330_v17 }
 0x42d   :  { %1332 = vmatprep.subr.bf16.mxu0 %v1419_v6  ;;  %1358 = vmatpush3.bf16.msra.mxu1 %v1357_v47 }
 0x42e   :  { %1359 = vmatprep.subr.bf16.mxu1 %v1419_v6 }
 0x430   :  { %1334 = vmatpush3.bf16.msra.mxu0 %v1333_v21 }
 0x431   :  { %1335 = vmatprep.subr.bf16.mxu0 %v1419_v6  ;;  %1361 = vmatpush3.bf16.msra.mxu1 %v1360_v50 }
 0x434   :  { %1337 = vmatpush3.bf16.msra.mxu0 %v1336_v26 }
 0x437   :  { %1196 = vmatmul.mubr.msk.f32.vlgmr.msra.gmra.mrb[8].mxu0 %vm612_vm2, %v618_v29 }
 0x4f2   :  { %v1043_v51 = vpop.f32.mrb[6].mxu0 }
 0x4f3   :  { %v1044_v52 = vpop.f32.mrb[7].mxu0 }
 0x4f4   :  { %v1045_v53 = vadd.f32 %v1044_v52, %v1043_v51 }
 0x4f6   :  { %v740_v55 = vadd.f32 %v1045_v53, %v958_v54 }
 0x50a   :  { %v809_v56 = vpop.f32.mrb[8].mxu0 }
 0x50b   :  { %v810_v6 = vadd.f32 %v809_v56, %v740_v55  ;;  %v1197_v57 = vpop.f32.mrb[9].mxu0 }
 0x50d   :  { %v813_v58 = vmax.f32 %v810_v6, 0.0 }
 0x50f   :  { %1231 = vmatmul.mubr.f32.vlgmr.msra.gmra.mrb[16].mxu1 %v813_v58 }
 0x5e2   :  { %v903_v60 = vpop.f32.mrb[16].mxu1 }
 0x5e3   :  { %v904_v61 = vadd.f32 %v960_v59, %v903_v60  ;;  %v1232_v62 = vpop.f32.mrb[17].mxu1 }
 0x5e5   :  { %v908_v63 = vsel %vm907_vm3, %v904_v61, -1e+30 }
 0x5e6   :  { %v909_v0 = vsel %vm370_vm9, %v908_v63, -inf }
 0x5e7   :  { %910 = vmax.xlane.f32.xlu1 %v909_v0 }
 0x674   :  { %v911_v1 = vpop.xlane.xlu1 %910 }
 0x675   :  { %v912_v2 = vsub.f32 %v908_v63, %v911_v1 }
 0x677   :  { %v913_v3 = vmul.f32 1.442695, %v912_v2 }
 0x679   :  { %1389 = vpow2.f32 %v913_v3 }
 0x683   :  { %v1390_v4 = vpop.eup %1389 }
 0x684   :  { %v915_v5 = vsel %vm907_vm3, %v1390_v4, 0.0 }
 0x685   :  { %v916_v7 = vsel %vm370_vm9, %v915_v5, 0.0 }
 0x686   :  { %917 = vadd.xlane.f32.xlu0 %v916_v7 }
 0x713   :  { %v918_v8 = vpop.xlane.xlu0 %917 }
 0x714   :  { %1391 = vlog2.f32 %v918_v8 }
 0x71e   :  { %v1392_v9 = vpop.eup %1391 }
 0x71f   :  { %v920_v20 = vmul.f32 0.6931472, %v1392_v9 }
 0x721   :  { %v921_v10 = vsub.f32 %v912_v2, %v920_v20 }
 0x723   :  { %922 = vst [vmem:[#allocation2] sm:$0x3] %v921_v10 }
 0x724   :  { %1404 = shalt.err (!%p1401_p4)
}
 0x725   :  { %s1405_s30 = scalar_lea.hbm %s1924_s10, 32 }
 0x726   :  { %p1406_p5 = scmp.ne.s32.totalorder %s1924_s10, %s1405_s30  ;;  %p1409_p6 = scmp.lt.u32.totalorder %s1405_s30, %s1924_s10 }
 0x728   :  { %p1411_p7 = pnand %p1409_p6, %p1406_p5 }
 0x72a   :  { %1414 = shalt.err (!%p1411_p7)
}
 0x72b   :  { %932 = dma.vmem_to_hbm [thread:$0]  %s930_s8, 32, %s1924_s10, [#allocation3]  }
 0x72c   :  { %1415 = dma.done.wait [#allocation3], 32  }
 0x72d   :  { %1416 = vsyncadd [#allocation3], 4294967264 }
 0x72e   :  { %936 = vsyncpa [#allocation3], 1 }

</bundles_post_ra>
